<compile_context>
chip_gen: v6e
topology: v6e:2x2x1
jax: 0.10.0
libtpu: 0.0.40
codegen_flags: <defaults>
</compile_context>

<pallas_src>
import functools

import jax
import jax.numpy as jnp
from jax.experimental import pallas as pl
from jax.experimental.pallas import tpu as pltpu


def _lstm_fc_kernel(x_ref, w0_ref, bias_ref, wr_ref, wfc_ref, bfc_ref, out_ref,
                    *, B, T, H):
    """Wavefront-pipelined 2-layer LSTM + final Linear, entirely in VMEM.

    Lane layout of the fused 8H-wide gate/state axis (blocks of H lanes):
        [ i0 | f0 | g0 | o0 | i1 | f1 | g1 | o1 ]
    State is kept in the same wide layout:
        c_wide: c0 at the f0 block, c1 at the f1 block   (rest: don't-care)
        h_wide: h0 at the o0 block, h1 at the o1 block   (rest: don't-care)
    Don't-care lanes never leak: the fused recurrent weight has zero rows
    everywhere except the h0/h1 lane blocks.
    """
    H4, H8 = 4 * H, 8 * H

    # ---- batched layer-0 input projection over the whole sequence ----------
    # w0_ref = [wih0 | 0] (I, 8H), bias_ref = [b0 | b1] (1, 8H)
    #   => pre[:, :4H] = x_t @ wih0 + b0,   pre[:, 4H:] = b1 (broadcast)
    pre = (jnp.dot(x_ref[...], w0_ref[...], preferred_element_type=jnp.float32)
           + bias_ref[...])                        # (T*B, 8H), time-major rows

    wr = wr_ref[...]                               # (8H, 8H) fused recurrent weight

    # Lane masks: built once, hoisted out of the loop.
    lane = jax.lax.broadcasted_iota(jnp.int32, (B, H8), 1)
    g_mask = (((lane >= 2 * H) & (lane < 3 * H)) |
              ((lane >= 6 * H) & (lane < 7 * H)))          # g-gate columns
    layer0_mask = (lane < H4).astype(jnp.float32)          # keep lower half only

    def wavefront_step(h_wide, c_wide, pre_t, first):
        # One fused MXU dot yields layer-0 gates (time t) and layer-1 gates
        # (time t-1); both depend only on the *previous* wide state.
        if first:
            gates = pre_t                                   # h_wide == 0: skip dot
        else:
            gates = (jnp.dot(h_wide, wr, preferred_element_type=jnp.float32)
                     + pre_t)                               # (B, 8H)
        # Single full-width sigmoid; g columns were pre-scaled by 2, so
        # tanh(x) = 2*sigmoid(2x) - 1 is recovered with a lane-masked fixup.
        s = jax.nn.sigmoid(gates)
        act = jnp.where(g_mask, 2.0 * s - 1.0, s)
        # c_new = f*c + i*g  (valid at the f blocks); alignment via lane rolls
        # (XLU), never via sub-vreg lane slices.
        prod_fc = act * c_wide
        prod_ig = act * pltpu.roll(act, shift=2 * H, axis=1)         # i*g at g blocks
        c_new = prod_fc + pltpu.roll(prod_ig, shift=H8 - H, axis=1)  # -> f blocks
        # h_new = o * tanh(c_new)  (valid at the o blocks).
        h_new = act * pltpu.roll(jnp.tanh(c_new), shift=2 * H, axis=1)
        return h_new, c_new

    zeros = jnp.zeros((B, H8), jnp.float32)

    # Wavefront step 0: layer-0 processes time 0; layer-1 has not started yet,
    # so its half of the new state is masked back to its zero initial value.
    h, c = wavefront_step(zeros, zeros, pre[0:B], True)
    h = h * layer0_mask
    c = c * layer0_mask

    # Steps 1..T-1 (fully unrolled): layer-0 time t + layer-1 time t-1, fused.
    for t in range(1, T):
        h, c = wavefront_step(h, c, pre[t * B:(t + 1) * B], False)

    # Epilogue: layer-1 time T-1 (the layer-0 half of this step is discarded;
    # its pre slab is simply reused).
    h, c = wavefront_step(h, c, pre[(T - 1) * B:T * B], False)

    # fc on the last time step of the top layer (h1_{T-1}, at the o1 block).
    h_top = h[:, 7 * H:8 * H]                              # (B, H)
    out_ref[...] = (jnp.dot(h_top, wfc_ref[...], preferred_element_type=jnp.float32)
                    + bfc_ref[...])


@jax.jit
def rnn_model_forward(x, params):
    """x: (B, T, I) float32 (batch_first, like PyTorch); params as in init_params."""
    wih0, whh0, b0, wih1, whh1, b1, wfc, bfc = params
    B, T, I = x.shape
    H = whh0.shape[0]
    H4, H8 = 4 * H, 8 * H
    C = wfc.shape[1]

    # ---- one-time kernel-layout weight prep (tiny; fused under jit) --------
    # Pre-scale g-gate columns by 2 so the kernel can use one full-width
    # sigmoid and recover tanh(x) as 2*sigmoid(2x) - 1.
    col = jnp.arange(H4)
    g2 = jnp.where((col >= 2 * H) & (col < 3 * H), 2.0, 1.0).astype(jnp.float32)
    wih0_s, whh0_s, b0_s = wih0 * g2, whh0 * g2, b0 * g2
    wih1_s, whh1_s, b1_s = wih1 * g2, whh1 * g2, b1 * g2

    # Layer-0 batched projection weight widened to 8H (upper half zero so the
    # bias add broadcasts b1 into the layer-1 half of every per-step slab).
    w0_ext = jnp.concatenate([wih0_s, jnp.zeros((I, H4), jnp.float32)], axis=1)
    bias_ext = jnp.concatenate([b0_s, b1_s], axis=1)

    # Fused recurrent weight, rows indexed by the wide state lane layout:
    # h0 lives at lanes [3H,4H) (o0 block), h1 at [7H,8H) (o1 block); all
    # other rows are zero so don't-care state lanes never contribute.
    w_big = jnp.zeros((H8, H8), jnp.float32)
    w_big = w_big.at[3 * H:4 * H, :].set(jnp.concatenate([whh0_s, wih1_s], axis=1))
    w_big = w_big.at[7 * H:8 * H, H4:].set(whh1_s)

    # Time-major rows so each per-step (B, 8H) slab is a contiguous, aligned
    # sublane block of the precomputed gate buffer.
    x_tm = jnp.swapaxes(x, 0, 1).reshape(T * B, I)

    vmem = pl.BlockSpec(memory_space=pltpu.MemorySpace.VMEM)
    kernel = functools.partial(_lstm_fc_kernel, B=B, T=T, H=H)
    # Gridless, whole-array VMEM blocks: working set << VMEM on v5e/v6e/v7x and
    # the kernel is serial-latency bound, so no tiling/pipelining machinery.
    # TODO(synk): if B grows, add a leading "parallel" grid axis over batch
    # shards so both v7x TensorCores get independent work.
    return pl.pallas_call(
        kernel,
        out_shape=jax.ShapeDtypeStruct((B, C), jnp.float32),
        in_specs=[vmem] * 6,
        out_specs=vmem,
    )(x_tm, w0_ext, bias_ext, w_big, wfc, bfc)


def init_params(key, input_size, hidden_size, num_classes):
    """Deterministic init mimicking PyTorch's U(-1/sqrt(H), 1/sqrt(H))."""
    k = 1.0 / jnp.sqrt(jnp.float32(hidden_size))
    ks = jax.random.split(key, 12)

    def u(k_, shape):
        return jax.random.uniform(k_, shape, jnp.float32, -k, k)

    # Layer 0 (input_size -> hidden), layer 1 (hidden -> hidden).
    # PyTorch stores weight_ih as (4H, in); here pre-transposed to (in, 4H).
    wih0 = u(ks[0], (input_size, 4 * hidden_size))
    whh0 = u(ks[1], (hidden_size, 4 * hidden_size))
    b0 = (u(ks[2], (1, 4 * hidden_size)) + u(ks[3], (1, 4 * hidden_size)))
    wih1 = u(ks[4], (hidden_size, 4 * hidden_size))
    whh1 = u(ks[5], (hidden_size, 4 * hidden_size))
    b1 = (u(ks[6], (1, 4 * hidden_size)) + u(ks[7], (1, 4 * hidden_size)))
    wfc = jax.random.uniform(ks[8], (hidden_size, num_classes), jnp.float32, -k, k)
    bfc = jax.random.uniform(ks[9], (1, num_classes), jnp.float32, -k, k)
    return (wih0, whh0, b0, wih1, whh1, b1, wfc, bfc)


def rnn_model_reference(x, params):
    """Pure-JAX reference of the same forward pass (for correctness check)."""
    wih0, whh0, b0, wih1, whh1, b1, wfc, bfc = params
    B, T, _ = x.shape
    H = whh0.shape[0]

    def run_layer(seq, wih, whh, b):
        h = jnp.zeros((B, H), jnp.float32)
        c = jnp.zeros((B, H), jnp.float32)
        outs = []
        for t in range(T):
            gates = seq[:, t, :] @ wih + h @ whh + b
            i = jax.nn.sigmoid(gates[:, :H])
            f = jax.nn.sigmoid(gates[:, H:2 * H])
            g = jnp.tanh(gates[:, 2 * H:3 * H])
            o = jax.nn.sigmoid(gates[:, 3 * H:])
            c = f * c + i * g
            h = o * jnp.tanh(c)
            outs.append(h)
        return jnp.stack(outs, axis=1)

    s = run_layer(x, wih0, whh0, b0)
    s = run_layer(s, wih1, whh1, b1)
    return s[:, -1, :] @ wfc + bfc


if __name__ == "__main__":
    # Small shapes implied by the module: model_type='LSTM', num_layers=2.
    B, T, INPUT_SIZE, HIDDEN, NUM_CLASSES = 8, 8, 16, 32, 10

    key = jax.random.PRNGKey(0)
    kx, kp = jax.random.split(key)
    x = jax.random.normal(kx, (B, T, INPUT_SIZE), jnp.float32)
    params = init_params(kp, INPUT_SIZE, HIDDEN, NUM_CLASSES)

    out = rnn_model_forward(x, params)
    out = jax.block_until_ready(out)

    ref = rnn_model_reference(x, params)
    assert out.shape == (B, NUM_CLASSES)
    # Tolerance covers the (exact-in-real-arithmetic) tanh(x)=2*sigmoid(2x)-1
    # rewrite and MXU f32 contraction reassociation in the fused dot.
    assert jnp.allclose(out, ref, atol=1e-4, rtol=1e-4), "mismatch vs reference"

    print("KERNEL_OK")
</pallas_src>

<mosaic_0001>
module attributes {stable_mosaic.version = 11 : i64} {
  func.func @_lstm_fc_kernel(%arg0: memref<64x16xf32, #tpu.memory_space<vmem>>, %arg1: memref<16x256xf32, #tpu.memory_space<vmem>>, %arg2: memref<1x256xf32, #tpu.memory_space<vmem>>, %arg3: memref<256x256xf32, #tpu.memory_space<vmem>>, %arg4: memref<32x10xf32, #tpu.memory_space<vmem>>, %arg5: memref<1x10xf32, #tpu.memory_space<vmem>>, %arg6: memref<8x10xf32, #tpu.memory_space<vmem>>) attributes {dimension_semantics = [], scalar_prefetch = 0 : i64, scratch_operands = 0 : i64, tpu.core_type = #tpu.core_type<tc>} {
    %c0 = arith.constant 0 : index
    %c0_0 = arith.constant 0 : index
    %0 = vector.load %arg0[%c0, %c0_0] : memref<64x16xf32, #tpu.memory_space<vmem>>, vector<64x16xf32>
    %c0_1 = arith.constant 0 : index
    %c0_2 = arith.constant 0 : index
    %1 = vector.load %arg1[%c0_1, %c0_2] : memref<16x256xf32, #tpu.memory_space<vmem>>, vector<16x256xf32>
    %cst = arith.constant dense<0.000000e+00> : vector<64x256xf32>
    %2 = tpu.matmul %0, %1, %cst {dimension_numbers = #tpu.dot_dimension_numbers<[1], [0], [0], [1], [0, 0, 1, 1], [], []>} : vector<64x16xf32>, vector<16x256xf32>, vector<64x256xf32> -> vector<64x256xf32>
    %c0_3 = arith.constant 0 : index
    %c0_4 = arith.constant 0 : index
    %3 = vector.load %arg2[%c0_3, %c0_4] : memref<1x256xf32, #tpu.memory_space<vmem>>, vector<1x256xf32>
    %4 = vector.broadcast %3 : vector<1x256xf32> to vector<64x256xf32>
    %5 = arith.addf %2, %4 : vector<64x256xf32>
    %c0_5 = arith.constant 0 : index
    %c0_6 = arith.constant 0 : index
    %6 = vector.load %arg3[%c0_5, %c0_6] : memref<256x256xf32, #tpu.memory_space<vmem>>, vector<256x256xf32>
    %7 = tpu.iota {dimensions = array<i32: 1>} : vector<8x256xi32>
    %c64_i32 = arith.constant 64 : i32
    %8 = vector.broadcast %c64_i32 : i32 to vector<8x256xi32>
    %9 = arith.cmpi sge, %7, %8 : vector<8x256xi32>
    %c96_i32 = arith.constant 96 : i32
    %10 = vector.broadcast %c96_i32 : i32 to vector<8x256xi32>
    %11 = arith.cmpi slt, %7, %10 : vector<8x256xi32>
    %12 = arith.andi %9, %11 : vector<8x256xi1>
    %c192_i32 = arith.constant 192 : i32
    %13 = vector.broadcast %c192_i32 : i32 to vector<8x256xi32>
    %14 = arith.cmpi sge, %7, %13 : vector<8x256xi32>
    %c224_i32 = arith.constant 224 : i32
    %15 = vector.broadcast %c224_i32 : i32 to vector<8x256xi32>
    %16 = arith.cmpi slt, %7, %15 : vector<8x256xi32>
    %17 = arith.andi %14, %16 : vector<8x256xi1>
    %18 = arith.ori %12, %17 : vector<8x256xi1>
    %c128_i32 = arith.constant 128 : i32
    %19 = vector.broadcast %c128_i32 : i32 to vector<8x256xi32>
    %20 = arith.cmpi slt, %7, %19 : vector<8x256xi32>
    %21 = arith.extui %20 : vector<8x256xi1> to vector<8x256xi32>
    %22 = arith.sitofp %21 : vector<8x256xi32> to vector<8x256xf32>
    %cst_7 = arith.constant 0.000000e+00 : f32
    %23 = vector.broadcast %cst_7 : f32 to vector<8x256xf32>
    %24 = vector.extract_strided_slice %5 {offsets = [0, 0], sizes = [8, 256], strides = [1, 1]} : vector<64x256xf32> to vector<8x256xf32>
    %25 = arith.negf %24 : vector<8x256xf32>
    %26 = math.exp %25 : vector<8x256xf32>
    %cst_8 = arith.constant 1.000000e+00 : f32
    %27 = vector.broadcast %cst_8 : f32 to vector<8x256xf32>
    %28 = arith.addf %27, %26 : vector<8x256xf32>
    %29 = arith.divf %27, %28 : vector<8x256xf32>
    %cst_9 = arith.constant 2.000000e+00 : f32
    %30 = vector.broadcast %cst_9 : f32 to vector<8x256xf32>
    %31 = arith.mulf %30, %29 : vector<8x256xf32>
    %cst_10 = arith.constant 1.000000e+00 : f32
    %32 = vector.broadcast %cst_10 : f32 to vector<8x256xf32>
    %33 = arith.subf %31, %32 : vector<8x256xf32>
    %34 = arith.select %18, %33, %29 : vector<8x256xi1>, vector<8x256xf32>
    %35 = arith.mulf %34, %23 : vector<8x256xf32>
    %c64_i32_11 = arith.constant 64 : i32
    %36 = tpu.dynamic_rotate %34 by %c64_i32_11 dim 1 : vector<8x256xf32>, i32 -> vector<8x256xf32>
    %37 = arith.mulf %34, %36 : vector<8x256xf32>
    %c224_i32_12 = arith.constant 224 : i32
    %38 = tpu.dynamic_rotate %37 by %c224_i32_12 dim 1 : vector<8x256xf32>, i32 -> vector<8x256xf32>
    %39 = arith.addf %35, %38 : vector<8x256xf32>
    %40 = math.tanh %39 : vector<8x256xf32>
    %c64_i32_13 = arith.constant 64 : i32
    %41 = tpu.dynamic_rotate %40 by %c64_i32_13 dim 1 : vector<8x256xf32>, i32 -> vector<8x256xf32>
    %42 = arith.mulf %34, %41 : vector<8x256xf32>
    %43 = arith.mulf %42, %22 : vector<8x256xf32>
    %44 = arith.mulf %39, %22 : vector<8x256xf32>
    %45 = vector.extract_strided_slice %5 {offsets = [8, 0], sizes = [8, 256], strides = [1, 1]} : vector<64x256xf32> to vector<8x256xf32>
    %cst_14 = arith.constant dense<0.000000e+00> : vector<8x256xf32>
    %46 = tpu.matmul %43, %6, %cst_14 {dimension_numbers = #tpu.dot_dimension_numbers<[1], [0], [0], [1], [0, 0, 1, 1], [], []>} : vector<8x256xf32>, vector<256x256xf32>, vector<8x256xf32> -> vector<8x256xf32>
    %47 = arith.addf %46, %45 : vector<8x256xf32>
    %48 = arith.negf %47 : vector<8x256xf32>
    %49 = math.exp %48 : vector<8x256xf32>
    %cst_15 = arith.constant 1.000000e+00 : f32
    %50 = vector.broadcast %cst_15 : f32 to vector<8x256xf32>
    %51 = arith.addf %50, %49 : vector<8x256xf32>
    %52 = arith.divf %50, %51 : vector<8x256xf32>
    %cst_16 = arith.constant 2.000000e+00 : f32
    %53 = vector.broadcast %cst_16 : f32 to vector<8x256xf32>
    %54 = arith.mulf %53, %52 : vector<8x256xf32>
    %cst_17 = arith.constant 1.000000e+00 : f32
    %55 = vector.broadcast %cst_17 : f32 to vector<8x256xf32>
    %56 = arith.subf %54, %55 : vector<8x256xf32>
    %57 = arith.select %18, %56, %52 : vector<8x256xi1>, vector<8x256xf32>
    %58 = arith.mulf %57, %44 : vector<8x256xf32>
    %c64_i32_18 = arith.constant 64 : i32
    %59 = tpu.dynamic_rotate %57 by %c64_i32_18 dim 1 : vector<8x256xf32>, i32 -> vector<8x256xf32>
    %60 = arith.mulf %57, %59 : vector<8x256xf32>
    %c224_i32_19 = arith.constant 224 : i32
    %61 = tpu.dynamic_rotate %60 by %c224_i32_19 dim 1 : vector<8x256xf32>, i32 -> vector<8x256xf32>
    %62 = arith.addf %58, %61 : vector<8x256xf32>
    %63 = math.tanh %62 : vector<8x256xf32>
    %c64_i32_20 = arith.constant 64 : i32
    %64 = tpu.dynamic_rotate %63 by %c64_i32_20 dim 1 : vector<8x256xf32>, i32 -> vector<8x256xf32>
    %65 = arith.mulf %57, %64 : vector<8x256xf32>
    %66 = vector.extract_strided_slice %5 {offsets = [16, 0], sizes = [8, 256], strides = [1, 1]} : vector<64x256xf32> to vector<8x256xf32>
    %cst_21 = arith.constant dense<0.000000e+00> : vector<8x256xf32>
    %67 = tpu.matmul %65, %6, %cst_21 {dimension_numbers = #tpu.dot_dimension_numbers<[1], [0], [0], [1], [0, 0, 1, 1], [], []>} : vector<8x256xf32>, vector<256x256xf32>, vector<8x256xf32> -> vector<8x256xf32>
    %68 = arith.addf %67, %66 : vector<8x256xf32>
    %69 = arith.negf %68 : vector<8x256xf32>
    %70 = math.exp %69 : vector<8x256xf32>
    %cst_22 = arith.constant 1.000000e+00 : f32
    %71 = vector.broadcast %cst_22 : f32 to vector<8x256xf32>
    %72 = arith.addf %71, %70 : vector<8x256xf32>
    %73 = arith.divf %71, %72 : vector<8x256xf32>
    %cst_23 = arith.constant 2.000000e+00 : f32
    %74 = vector.broadcast %cst_23 : f32 to vector<8x256xf32>
    %75 = arith.mulf %74, %73 : vector<8x256xf32>
    %cst_24 = arith.constant 1.000000e+00 : f32
    %76 = vector.broadcast %cst_24 : f32 to vector<8x256xf32>
    %77 = arith.subf %75, %76 : vector<8x256xf32>
    %78 = arith.select %18, %77, %73 : vector<8x256xi1>, vector<8x256xf32>
    %79 = arith.mulf %78, %62 : vector<8x256xf32>
    %c64_i32_25 = arith.constant 64 : i32
    %80 = tpu.dynamic_rotate %78 by %c64_i32_25 dim 1 : vector<8x256xf32>, i32 -> vector<8x256xf32>
    %81 = arith.mulf %78, %80 : vector<8x256xf32>
    %c224_i32_26 = arith.constant 224 : i32
    %82 = tpu.dynamic_rotate %81 by %c224_i32_26 dim 1 : vector<8x256xf32>, i32 -> vector<8x256xf32>
    %83 = arith.addf %79, %82 : vector<8x256xf32>
    %84 = math.tanh %83 : vector<8x256xf32>
    %c64_i32_27 = arith.constant 64 : i32
    %85 = tpu.dynamic_rotate %84 by %c64_i32_27 dim 1 : vector<8x256xf32>, i32 -> vector<8x256xf32>
    %86 = arith.mulf %78, %85 : vector<8x256xf32>
    %87 = vector.extract_strided_slice %5 {offsets = [24, 0], sizes = [8, 256], strides = [1, 1]} : vector<64x256xf32> to vector<8x256xf32>
    %cst_28 = arith.constant dense<0.000000e+00> : vector<8x256xf32>
    %88 = tpu.matmul %86, %6, %cst_28 {dimension_numbers = #tpu.dot_dimension_numbers<[1], [0], [0], [1], [0, 0, 1, 1], [], []>} : vector<8x256xf32>, vector<256x256xf32>, vector<8x256xf32> -> vector<8x256xf32>
    %89 = arith.addf %88, %87 : vector<8x256xf32>
    %90 = arith.negf %89 : vector<8x256xf32>
    %91 = math.exp %90 : vector<8x256xf32>
    %cst_29 = arith.constant 1.000000e+00 : f32
    %92 = vector.broadcast %cst_29 : f32 to vector<8x256xf32>
    %93 = arith.addf %92, %91 : vector<8x256xf32>
    %94 = arith.divf %92, %93 : vector<8x256xf32>
    %cst_30 = arith.constant 2.000000e+00 : f32
    %95 = vector.broadcast %cst_30 : f32 to vector<8x256xf32>
    %96 = arith.mulf %95, %94 : vector<8x256xf32>
    %cst_31 = arith.constant 1.000000e+00 : f32
    %97 = vector.broadcast %cst_31 : f32 to vector<8x256xf32>
    %98 = arith.subf %96, %97 : vector<8x256xf32>
    %99 = arith.select %18, %98, %94 : vector<8x256xi1>, vector<8x256xf32>
    %100 = arith.mulf %99, %83 : vector<8x256xf32>
    %c64_i32_32 = arith.constant 64 : i32
    %101 = tpu.dynamic_rotate %99 by %c64_i32_32 dim 1 : vector<8x256xf32>, i32 -> vector<8x256xf32>
    %102 = arith.mulf %99, %101 : vector<8x256xf32>
    %c224_i32_33 = arith.constant 224 : i32
    %103 = tpu.dynamic_rotate %102 by %c224_i32_33 dim 1 : vector<8x256xf32>, i32 -> vector<8x256xf32>
    %104 = arith.addf %100, %103 : vector<8x256xf32>
    %105 = math.tanh %104 : vector<8x256xf32>
    %c64_i32_34 = arith.constant 64 : i32
    %106 = tpu.dynamic_rotate %105 by %c64_i32_34 dim 1 : vector<8x256xf32>, i32 -> vector<8x256xf32>
    %107 = arith.mulf %99, %106 : vector<8x256xf32>
    %108 = vector.extract_strided_slice %5 {offsets = [32, 0], sizes = [8, 256], strides = [1, 1]} : vector<64x256xf32> to vector<8x256xf32>
    %cst_35 = arith.constant dense<0.000000e+00> : vector<8x256xf32>
    %109 = tpu.matmul %107, %6, %cst_35 {dimension_numbers = #tpu.dot_dimension_numbers<[1], [0], [0], [1], [0, 0, 1, 1], [], []>} : vector<8x256xf32>, vector<256x256xf32>, vector<8x256xf32> -> vector<8x256xf32>
    %110 = arith.addf %109, %108 : vector<8x256xf32>
    %111 = arith.negf %110 : vector<8x256xf32>
    %112 = math.exp %111 : vector<8x256xf32>
    %cst_36 = arith.constant 1.000000e+00 : f32
    %113 = vector.broadcast %cst_36 : f32 to vector<8x256xf32>
    %114 = arith.addf %113, %112 : vector<8x256xf32>
    %115 = arith.divf %113, %114 : vector<8x256xf32>
    %cst_37 = arith.constant 2.000000e+00 : f32
    %116 = vector.broadcast %cst_37 : f32 to vector<8x256xf32>
    %117 = arith.mulf %116, %115 : vector<8x256xf32>
    %cst_38 = arith.constant 1.000000e+00 : f32
    %118 = vector.broadcast %cst_38 : f32 to vector<8x256xf32>
    %119 = arith.subf %117, %118 : vector<8x256xf32>
    %120 = arith.select %18, %119, %115 : vector<8x256xi1>, vector<8x256xf32>
    %121 = arith.mulf %120, %104 : vector<8x256xf32>
    %c64_i32_39 = arith.constant 64 : i32
    %122 = tpu.dynamic_rotate %120 by %c64_i32_39 dim 1 : vector<8x256xf32>, i32 -> vector<8x256xf32>
    %123 = arith.mulf %120, %122 : vector<8x256xf32>
    %c224_i32_40 = arith.constant 224 : i32
    %124 = tpu.dynamic_rotate %123 by %c224_i32_40 dim 1 : vector<8x256xf32>, i32 -> vector<8x256xf32>
    %125 = arith.addf %121, %124 : vector<8x256xf32>
    %126 = math.tanh %125 : vector<8x256xf32>
    %c64_i32_41 = arith.constant 64 : i32
    %127 = tpu.dynamic_rotate %126 by %c64_i32_41 dim 1 : vector<8x256xf32>, i32 -> vector<8x256xf32>
    %128 = arith.mulf %120, %127 : vector<8x256xf32>
    %129 = vector.extract_strided_slice %5 {offsets = [40, 0], sizes = [8, 256], strides = [1, 1]} : vector<64x256xf32> to vector<8x256xf32>
    %cst_42 = arith.constant dense<0.000000e+00> : vector<8x256xf32>
    %130 = tpu.matmul %128, %6, %cst_42 {dimension_numbers = #tpu.dot_dimension_numbers<[1], [0], [0], [1], [0, 0, 1, 1], [], []>} : vector<8x256xf32>, vector<256x256xf32>, vector<8x256xf32> -> vector<8x256xf32>
    %131 = arith.addf %130, %129 : vector<8x256xf32>
    %132 = arith.negf %131 : vector<8x256xf32>
    %133 = math.exp %132 : vector<8x256xf32>
    %cst_43 = arith.constant 1.000000e+00 : f32
    %134 = vector.broadcast %cst_43 : f32 to vector<8x256xf32>
    %135 = arith.addf %134, %133 : vector<8x256xf32>
    %136 = arith.divf %134, %135 : vector<8x256xf32>
    %cst_44 = arith.constant 2.000000e+00 : f32
    %137 = vector.broadcast %cst_44 : f32 to vector<8x256xf32>
    %138 = arith.mulf %137, %136 : vector<8x256xf32>
    %cst_45 = arith.constant 1.000000e+00 : f32
    %139 = vector.broadcast %cst_45 : f32 to vector<8x256xf32>
    %140 = arith.subf %138, %139 : vector<8x256xf32>
    %141 = arith.select %18, %140, %136 : vector<8x256xi1>, vector<8x256xf32>
    %142 = arith.mulf %141, %125 : vector<8x256xf32>
    %c64_i32_46 = arith.constant 64 : i32
    %143 = tpu.dynamic_rotate %141 by %c64_i32_46 dim 1 : vector<8x256xf32>, i32 -> vector<8x256xf32>
    %144 = arith.mulf %141, %143 : vector<8x256xf32>
    %c224_i32_47 = arith.constant 224 : i32
    %145 = tpu.dynamic_rotate %144 by %c224_i32_47 dim 1 : vector<8x256xf32>, i32 -> vector<8x256xf32>
    %146 = arith.addf %142, %145 : vector<8x256xf32>
    %147 = math.tanh %146 : vector<8x256xf32>
    %c64_i32_48 = arith.constant 64 : i32
    %148 = tpu.dynamic_rotate %147 by %c64_i32_48 dim 1 : vector<8x256xf32>, i32 -> vector<8x256xf32>
    %149 = arith.mulf %141, %148 : vector<8x256xf32>
    %150 = vector.extract_strided_slice %5 {offsets = [48, 0], sizes = [8, 256], strides = [1, 1]} : vector<64x256xf32> to vector<8x256xf32>
    %cst_49 = arith.constant dense<0.000000e+00> : vector<8x256xf32>
    %151 = tpu.matmul %149, %6, %cst_49 {dimension_numbers = #tpu.dot_dimension_numbers<[1], [0], [0], [1], [0, 0, 1, 1], [], []>} : vector<8x256xf32>, vector<256x256xf32>, vector<8x256xf32> -> vector<8x256xf32>
    %152 = arith.addf %151, %150 : vector<8x256xf32>
    %153 = arith.negf %152 : vector<8x256xf32>
    %154 = math.exp %153 : vector<8x256xf32>
    %cst_50 = arith.constant 1.000000e+00 : f32
    %155 = vector.broadcast %cst_50 : f32 to vector<8x256xf32>
    %156 = arith.addf %155, %154 : vector<8x256xf32>
    %157 = arith.divf %155, %156 : vector<8x256xf32>
    %cst_51 = arith.constant 2.000000e+00 : f32
    %158 = vector.broadcast %cst_51 : f32 to vector<8x256xf32>
    %159 = arith.mulf %158, %157 : vector<8x256xf32>
    %cst_52 = arith.constant 1.000000e+00 : f32
    %160 = vector.broadcast %cst_52 : f32 to vector<8x256xf32>
    %161 = arith.subf %159, %160 : vector<8x256xf32>
    %162 = arith.select %18, %161, %157 : vector<8x256xi1>, vector<8x256xf32>
    %163 = arith.mulf %162, %146 : vector<8x256xf32>
    %c64_i32_53 = arith.constant 64 : i32
    %164 = tpu.dynamic_rotate %162 by %c64_i32_53 dim 1 : vector<8x256xf32>, i32 -> vector<8x256xf32>
    %165 = arith.mulf %162, %164 : vector<8x256xf32>
    %c224_i32_54 = arith.constant 224 : i32
    %166 = tpu.dynamic_rotate %165 by %c224_i32_54 dim 1 : vector<8x256xf32>, i32 -> vector<8x256xf32>
    %167 = arith.addf %163, %166 : vector<8x256xf32>
    %168 = math.tanh %167 : vector<8x256xf32>
    %c64_i32_55 = arith.constant 64 : i32
    %169 = tpu.dynamic_rotate %168 by %c64_i32_55 dim 1 : vector<8x256xf32>, i32 -> vector<8x256xf32>
    %170 = arith.mulf %162, %169 : vector<8x256xf32>
    %171 = vector.extract_strided_slice %5 {offsets = [56, 0], sizes = [8, 256], strides = [1, 1]} : vector<64x256xf32> to vector<8x256xf32>
    %cst_56 = arith.constant dense<0.000000e+00> : vector<8x256xf32>
    %172 = tpu.matmul %170, %6, %cst_56 {dimension_numbers = #tpu.dot_dimension_numbers<[1], [0], [0], [1], [0, 0, 1, 1], [], []>} : vector<8x256xf32>, vector<256x256xf32>, vector<8x256xf32> -> vector<8x256xf32>
    %173 = arith.addf %172, %171 : vector<8x256xf32>
    %174 = arith.negf %173 : vector<8x256xf32>
    %175 = math.exp %174 : vector<8x256xf32>
    %cst_57 = arith.constant 1.000000e+00 : f32
    %176 = vector.broadcast %cst_57 : f32 to vector<8x256xf32>
    %177 = arith.addf %176, %175 : vector<8x256xf32>
    %178 = arith.divf %176, %177 : vector<8x256xf32>
    %cst_58 = arith.constant 2.000000e+00 : f32
    %179 = vector.broadcast %cst_58 : f32 to vector<8x256xf32>
    %180 = arith.mulf %179, %178 : vector<8x256xf32>
    %cst_59 = arith.constant 1.000000e+00 : f32
    %181 = vector.broadcast %cst_59 : f32 to vector<8x256xf32>
    %182 = arith.subf %180, %181 : vector<8x256xf32>
    %183 = arith.select %18, %182, %178 : vector<8x256xi1>, vector<8x256xf32>
    %184 = arith.mulf %183, %167 : vector<8x256xf32>
    %c64_i32_60 = arith.constant 64 : i32
    %185 = tpu.dynamic_rotate %183 by %c64_i32_60 dim 1 : vector<8x256xf32>, i32 -> vector<8x256xf32>
    %186 = arith.mulf %183, %185 : vector<8x256xf32>
    %c224_i32_61 = arith.constant 224 : i32
    %187 = tpu.dynamic_rotate %186 by %c224_i32_61 dim 1 : vector<8x256xf32>, i32 -> vector<8x256xf32>
    %188 = arith.addf %184, %187 : vector<8x256xf32>
    %189 = math.tanh %188 : vector<8x256xf32>
    %c64_i32_62 = arith.constant 64 : i32
    %190 = tpu.dynamic_rotate %189 by %c64_i32_62 dim 1 : vector<8x256xf32>, i32 -> vector<8x256xf32>
    %191 = arith.mulf %183, %190 : vector<8x256xf32>
    %192 = vector.extract_strided_slice %5 {offsets = [56, 0], sizes = [8, 256], strides = [1, 1]} : vector<64x256xf32> to vector<8x256xf32>
    %cst_63 = arith.constant dense<0.000000e+00> : vector<8x256xf32>
    %193 = tpu.matmul %191, %6, %cst_63 {dimension_numbers = #tpu.dot_dimension_numbers<[1], [0], [0], [1], [0, 0, 1, 1], [], []>} : vector<8x256xf32>, vector<256x256xf32>, vector<8x256xf32> -> vector<8x256xf32>
    %194 = arith.addf %193, %192 : vector<8x256xf32>
    %195 = arith.negf %194 : vector<8x256xf32>
    %196 = math.exp %195 : vector<8x256xf32>
    %cst_64 = arith.constant 1.000000e+00 : f32
    %197 = vector.broadcast %cst_64 : f32 to vector<8x256xf32>
    %198 = arith.addf %197, %196 : vector<8x256xf32>
    %199 = arith.divf %197, %198 : vector<8x256xf32>
    %cst_65 = arith.constant 2.000000e+00 : f32
    %200 = vector.broadcast %cst_65 : f32 to vector<8x256xf32>
    %201 = arith.mulf %200, %199 : vector<8x256xf32>
    %cst_66 = arith.constant 1.000000e+00 : f32
    %202 = vector.broadcast %cst_66 : f32 to vector<8x256xf32>
    %203 = arith.subf %201, %202 : vector<8x256xf32>
    %204 = arith.select %18, %203, %199 : vector<8x256xi1>, vector<8x256xf32>
    %205 = arith.mulf %204, %188 : vector<8x256xf32>
    %c64_i32_67 = arith.constant 64 : i32
    %206 = tpu.dynamic_rotate %204 by %c64_i32_67 dim 1 : vector<8x256xf32>, i32 -> vector<8x256xf32>
    %207 = arith.mulf %204, %206 : vector<8x256xf32>
    %c224_i32_68 = arith.constant 224 : i32
    %208 = tpu.dynamic_rotate %207 by %c224_i32_68 dim 1 : vector<8x256xf32>, i32 -> vector<8x256xf32>
    %209 = arith.addf %205, %208 : vector<8x256xf32>
    %210 = math.tanh %209 : vector<8x256xf32>
    %c64_i32_69 = arith.constant 64 : i32
    %211 = tpu.dynamic_rotate %210 by %c64_i32_69 dim 1 : vector<8x256xf32>, i32 -> vector<8x256xf32>
    %212 = arith.mulf %204, %211 : vector<8x256xf32>
    %213 = vector.extract_strided_slice %212 {offsets = [0, 224], sizes = [8, 32], strides = [1, 1]} : vector<8x256xf32> to vector<8x32xf32>
    %c0_70 = arith.constant 0 : index
    %c0_71 = arith.constant 0 : index
    %214 = vector.load %arg4[%c0_70, %c0_71] : memref<32x10xf32, #tpu.memory_space<vmem>>, vector<32x10xf32>
    %cst_72 = arith.constant dense<0.000000e+00> : vector<8x10xf32>
    %215 = tpu.matmul %213, %214, %cst_72 {dimension_numbers = #tpu.dot_dimension_numbers<[1], [0], [0], [1], [0, 0, 1, 1], [], []>} : vector<8x32xf32>, vector<32x10xf32>, vector<8x10xf32> -> vector<8x10xf32>
    %c0_73 = arith.constant 0 : index
    %c0_74 = arith.constant 0 : index
    %216 = vector.load %arg5[%c0_73, %c0_74] : memref<1x10xf32, #tpu.memory_space<vmem>>, vector<1x10xf32>
    %217 = vector.broadcast %216 : vector<1x10xf32> to vector<8x10xf32>
    %218 = arith.addf %215, %217 : vector<8x10xf32>
    %c0_75 = arith.constant 0 : index
    %c0_76 = arith.constant 0 : index
    %219 = vector.load %arg6[%c0_75, %c0_76] : memref<8x10xf32, #tpu.memory_space<vmem>>, vector<8x10xf32>
    tpu.vector_store %arg6[%c0_75, %c0_76], %218 {strides = array<i32>} : memref<8x10xf32, #tpu.memory_space<vmem>>, vector<8x10xf32>,
    return
  }
}

</mosaic_0001>

<bundles_post_ra>
// kernel: rnn_model_forward.1
= control target key start
LH: loop header
LB: loop body
LE: loop exit
PB: predicated region body
PF: predicated region fallthrough
CT: control target
= control target key end

     0   :  { %v3223_v4 = vmov 0.0   ;;  %vm48_vm0 = vcmask 130048   ;;  %s3216_s0 = inlined_call_operand.vmem [shape: f32[64,16], index: 0, kind: input, shape index: {}]   ;;  %s3217_s1 = inlined_call_operand.vmem [shape: f32[16,256], index: 1, kind: input, shape index: {}]   ;;  %s3218_s2 = inlined_call_operand.vmem [shape: f32[1,256], index: 2, kind: input, shape index: {}]   ;;  %s3219_s3 = inlined_call_operand.vmem [shape: f32[256,256], index: 3, kind: input, shape index: {}]   ;;  %s3220_s4 = inlined_call_operand.vmem [shape: f32[32,10], index: 4, kind: input, shape index: {}]   ;;  %s3221_s5 = inlined_call_operand.vmem [shape: f32[1,10], index: 5, kind: input, shape index: {}]   ;;  %s3222_s6 = inlined_call_operand.hbm [shape: f32[8,10], index: 6, kind: output, shape index: {}]  }
   0x1   :  { %v35_v0 = vld [vmem:[%s3217_s1 + $0x18] sm:$0xff]  ;;  %v34_v1 = vld [vmem:[%s3217_s1 + $0x10] sm:$0xff]  ;;  %v33_v2 = vld [vmem:[%s3217_s1 + $0x8] sm:$0xff]  ;;  %137 = vmatprep.mubr.f32.mxu0 %v3223_v4 }
   0x2   :  { %101 = vmatprep.subr.mxu0 %v35_v0  ;;  %v32_v3 = vld [vmem:[%s3217_s1] sm:$0xff] }
   0x3   :  { %102 = vmatpush1.msra.mxu0 %v34_v1  ;;  %v24_v5 = vld [vmem:[%s3216_s0] sm:$0xff] }
   0x4   :  { %11 = vsyncpa [#allocation3], 0  ;;  %103 = vmatprep.subr.mxu0 %v33_v2  ;;  %v38_v6 = vlaneseq  ;;  %v36_v9 = vld [vmem:[%s3218_s2] sm:$0x3]  ;;  %v3318_v28 = vmov 0  ;;  %s1624_s2 = smov 64  }
   0x5   :  { %104 = vmatpush1.msra.mxu0 %v32_v3  ;;  %v3321_v33 = vmov 0  ;;  %s1625_s8 = smov 96   ;;  %v1730_v41 = vld [vmem:[%s3219_s3 + $0xf8] sm:$0xff]  ;;  %v1735_v42 = vld [vmem:[%s3219_s3 + $0xf0] sm:$0xff]  ;;  %v1740_v43 = vld [vmem:[%s3219_s3 + $0xe8] sm:$0xff]  ;;  %vm1626_vm8 = vmmov 0  }
   0x6   :  { %1361 = vmatmul.mubr.msk.f32.vlgmr.msra.gmra.mxu0 %vm48_vm0, %v24_v5  ;;  %v39_v7 = vshrl.u32 %v38_v6, 7  ;;  %v1691_v23 = vand.u32 127, %v38_v6  ;;  %3324 = vst [vmem:[#allocation9_spill] sm:$0xff] %v1730_v41  ;;  %324 = vmatprep.subr.mxu1 %v1730_v41  ;;  %v1746_v44 = vld [vmem:[%s3219_s3 + $0xe0] sm:$0xff]  ;;  %v1753_v45 = vld [vmem:[%s3219_s3 + $0xd8] sm:$0xff]  ;;  %v1760_v46 = vld [vmem:[%s3219_s3 + $0xd0] sm:$0xff] }
   0x7   :  { %143 = vmatprep.mubr.f32.mxu0 %v3223_v4  ;;  %441 = vmatprep.subr.mxu0 %v1730_v41  ;;  %v1767_v47 = vld [vmem:[%s3219_s3 + $0xc8] sm:$0xff]  ;;  %v1774_v48 = vld [vmem:[%s3219_s3 + $0xc0] sm:$0xff]  ;;  %v1781_v49 = vld [vmem:[%s3219_s3 + $0xb8] sm:$0xff]  ;;  %s1627_s15 = smov 32   ;;  %vm1272_vm9 = vcmask 261120   ;;  %s1628_s17 = smov [#allocation2]  }
   0x8   :  { %v40_v8 = vsub.s32 0, %v39_v7  ;;  %v44_v10 = vsub.s32 1, %v39_v7  ;;  %vm253_vm1 = vcmp.ge.s32.totalorder %v1691_v23, 64  ;;  %vm255_vm2 = vcmp.lt.s32.totalorder %v1691_v23, 96  ;;  %325 = vmatpush1.msra.mxu1 %v1735_v42  ;;  %442 = vmatpush1.msra.mxu0 %v1735_v42  ;;  %v1788_v50 = vld [vmem:[%s3219_s3 + $0xb0] sm:$0xff]  ;;  %v1795_v51 = vld [vmem:[%s3219_s3 + $0xa8] sm:$0xff] }
   0x9   :  { %v252_v24 = vadd.s32 128, %v1691_v23  ;;  %vm1698_vm3 = vmand %vm253_vm1, %vm255_vm2  ;;  %vm297_vm7 = vcmp.lt.s32.totalorder %v1691_v23, 64  ;;  %326 = vmatprep.subr.mxu1 %v1740_v43  ;;  %443 = vmatprep.subr.mxu0 %v1740_v43  ;;  %v1802_v52 = vld [vmem:[%s3219_s3 + $0xa0] sm:$0xff]  ;;  %v1809_v53 = vld [vmem:[%s3219_s3 + $0x98] sm:$0xff]  ;;  %s1353_s18 = sshll.u32 %s1628_s17, 4  ;;  %vm1345_vm10 = vcmask 80896   ;;  %s1354_s18 = int_to_ptr.vmem [resolvable:$true] %s1353_s18 }
   0xa   :  { %v1685_v11 = vrot.slane %v36_v9, %v40_v8  ;;  %v1687_v12 = vrot.slane %v36_v9, %v44_v10  ;;  %v3319_v28 = vsel %vm1698_vm3, 4294967295, %v3318_v28  ;;  %327 = vmatpush1.msra.mxu1 %v1746_v44  ;;  %444 = vmatpush1.msra.mxu0 %v1746_v44  ;;  %v1816_v54 = vld [vmem:[%s3219_s3 + $0x90] sm:$0xff]  ;;  %v1823_v55 = vld [vmem:[%s3219_s3 + $0x88] sm:$0xff]  ;;  %v1830_v56 = vld [vmem:[%s3219_s3 + $0x80] sm:$0xff]  ;;  %p1606_p1 = scmp.lt.s32.totalorder %s1354_s18, %s1354_s18 }
   0xb   :  { %3320 = vst [vmem:[#allocation7_spill] sm:$0xff] %v3319_v28  ;;  %vm260_vm4 = vcmp.ge.s32.totalorder %v252_v24, 192  ;;  %vm262_vm5 = vcmp.lt.s32.totalorder %v252_v24, 224  ;;  %328 = vmatprep.subr.mxu1 %v1753_v45  ;;  %445 = vmatprep.subr.mxu0 %v1753_v45  ;;  %v1837_v57 = vld [vmem:[%s3219_s3 + $0x78] sm:$0xff]  ;;  %v1844_v58 = vld [vmem:[%s3219_s3 + $0x70] sm:$0xff]  ;;  %v1851_v59 = vld [vmem:[%s3219_s3 + $0x68] sm:$0xff] }
   0xc   :  { %3316 = vst [vmem:[#allocation5_spill] sm:$0xff] %v1685_v11  ;;  %3317 = vst [vmem:[#allocation6_spill] sm:$0xff] %v1687_v12  ;;  %329 = vmatpush1.msra.mxu1 %v1760_v46  ;;  %446 = vmatpush1.msra.mxu0 %v1760_v46  ;;  %v1858_v60 = vld [vmem:[%s3219_s3 + $0x60] sm:$0xff]  ;;  %v1865_v61 = vld [vmem:[%s3219_s3 + $0x58] sm:$0xff] }
   0xd   :  { %vm1708_vm6 = vmand %vm260_vm4, %vm262_vm5  ;;  %330 = vmatprep.subr.mxu1 %v1767_v47  ;;  %447 = vmatprep.subr.mxu0 %v1767_v47  ;;  %v1872_v62 = vld [vmem:[%s3219_s3 + $0x50] sm:$0xff]  ;;  %v1879_v63 = vld [vmem:[%s3219_s3 + $0x48] sm:$0xff] }
   0xe   :  { %v3322_v33 = vsel %vm1708_vm6, 4294967295, %v3321_v33  ;;  %331 = vmatpush1.msra.mxu1 %v1774_v48  ;;  %448 = vmatpush1.msra.mxu0 %v1774_v48  ;;  %v1886_v0 = vld [vmem:[%s3219_s3 + $0x40] sm:$0xff]  ;;  %v1893_v1 = vld [vmem:[%s3219_s3 + $0x38] sm:$0xff]  ;;  %v1900_v2 = vld [vmem:[%s3219_s3 + $0x30] sm:$0xff] }
   0xf   :  { %3323 = vst [vmem:[#allocation8_spill] sm:$0xff] %v3322_v33  ;;  %332 = vmatprep.subr.mxu1 %v1781_v49  ;;  %449 = vmatprep.subr.mxu0 %v1781_v49  ;;  %v1907_v3 = vld [vmem:[%s3219_s3 + $0x28] sm:$0xff]  ;;  %v1914_v5 = vld [vmem:[%s3219_s3 + $0x20] sm:$0xff]  ;;  %v1921_v6 = vld [vmem:[%s3219_s3 + $0x18] sm:$0xff] }
  0x10   :  { %333 = vmatpush1.msra.mxu1 %v1788_v50  ;;  %450 = vmatpush1.msra.mxu0 %v1788_v50  ;;  %v1928_v7 = vld [vmem:[%s3219_s3 + $0x10] sm:$0xff]  ;;  %v1935_v8 = vld [vmem:[%s3219_s3 + $0x8] sm:$0xff]  ;;  %v1942_v9 = vld [vmem:[%s3219_s3] sm:$0xff] }
  0x11   :  { %334 = vmatprep.subr.mxu1 %v1795_v51  ;;  %451 = vmatprep.subr.mxu0 %v1795_v51  ;;  %v1949_v10 = vld [vmem:[%s3219_s3 + $0x1f8] sm:$0xff]  ;;  %v2026_v24 = vld [vmem:[%s3219_s3 + $0x1a0] sm:$0xff]  ;;  %v2124_v33 = vld [vmem:[%s3219_s3 + $0x130] sm:$0xff] }
  0x12   :  { %335 = vmatpush1.msra.mxu1 %v1802_v52  ;;  %452 = vmatpush1.msra.mxu0 %v1802_v52  ;;  %3327 = vst [vmem:[#allocation12_spill] sm:$0xff] %v2026_v24  ;;  %v2117_v4 = vld [vmem:[%s3219_s3 + $0x138] sm:$0xff]  ;;  %3341 = vst [vmem:[#allocation26_spill] sm:$0xff] %v2124_v33 }
  0x13   :  { %336 = vmatprep.subr.mxu1 %v1809_v53  ;;  %453 = vmatprep.subr.mxu0 %v1809_v53  ;;  %3340 = vst [vmem:[#allocation25_spill] sm:$0xff] %v2117_v4 }
  0x14   :  { %337 = vmatpush1.msra.mxu1 %v1816_v54  ;;  %454 = vmatpush1.msra.mxu0 %v1816_v54 }
  0x15   :  { %338 = vmatprep.subr.mxu1 %v1823_v55  ;;  %455 = vmatprep.subr.mxu0 %v1823_v55 }
  0x16   :  { %339 = vmatpush1.msra.mxu1 %v1830_v56  ;;  %456 = vmatpush1.msra.mxu0 %v1830_v56 }
  0x17   :  { %340 = vmatprep.subr.mxu1 %v1837_v57  ;;  %457 = vmatprep.subr.mxu0 %v1837_v57 }
  0x18   :  { %341 = vmatpush1.msra.mxu1 %v1844_v58  ;;  %458 = vmatpush1.msra.mxu0 %v1844_v58 }
  0x19   :  { %342 = vmatprep.subr.mxu1 %v1851_v59  ;;  %459 = vmatprep.subr.mxu0 %v1851_v59 }
  0x1a   :  { %343 = vmatpush1.msra.mxu1 %v1858_v60  ;;  %460 = vmatpush1.msra.mxu0 %v1858_v60 }
  0x1b   :  { %344 = vmatprep.subr.mxu1 %v1865_v61  ;;  %461 = vmatprep.subr.mxu0 %v1865_v61 }
  0x1c   :  { %345 = vmatpush1.msra.mxu1 %v1872_v62  ;;  %462 = vmatpush1.msra.mxu0 %v1872_v62 }
  0x1d   :  { %346 = vmatprep.subr.mxu1 %v1879_v63  ;;  %463 = vmatprep.subr.mxu0 %v1879_v63 }
  0x1e   :  { %347 = vmatpush1.msra.mxu1 %v1886_v0  ;;  %464 = vmatpush1.msra.mxu0 %v1886_v0 }
  0x1f   :  { %348 = vmatprep.subr.mxu1 %v1893_v1  ;;  %465 = vmatprep.subr.mxu0 %v1893_v1 }
  0x20   :  { %349 = vmatpush1.msra.mxu1 %v1900_v2  ;;  %466 = vmatpush1.msra.mxu0 %v1900_v2 }
  0x21   :  { %350 = vmatprep.subr.mxu1 %v1907_v3  ;;  %467 = vmatprep.subr.mxu0 %v1907_v3 }
  0x22   :  { %351 = vmatpush1.msra.mxu1 %v1914_v5  ;;  %468 = vmatpush1.msra.mxu0 %v1914_v5 }
  0x23   :  { %352 = vmatprep.subr.mxu1 %v1921_v6  ;;  %469 = vmatprep.subr.mxu0 %v1921_v6 }
  0x24   :  { %353 = vmatpush1.msra.mxu1 %v1928_v7  ;;  %470 = vmatpush1.msra.mxu0 %v1928_v7 }
  0x25   :  { %354 = vmatprep.subr.mxu1 %v1935_v8  ;;  %471 = vmatprep.subr.mxu0 %v1935_v8 }
  0x26   :  { %355 = vmatpush1.msra.mxu1 %v1942_v9  ;;  %472 = vmatpush1.msra.mxu0 %v1942_v9 }
  0x27   :  { %356 = vmatprep.subr.mxu1 %v1949_v10  ;;  %473 = vmatprep.subr.mxu0 %v1949_v10 }
  0xc6   :  { %v139_v13 = vpop.f32.mrf.mxu0 }
  0xc7   :  { %v140_v14 = vadd.f32 %v139_v13, %v1685_v11  ;;  %v1956_v13 = vld [vmem:[%s3219_s3 + $0x1f0] sm:$0xff] }
  0xc8   :  { %v141_v15 = vpop.f32.mrf.mxu0  ;;  %357 = vmatpush2.msra.mxu1 %v1956_v13  ;;  %474 = vmatpush2.msra.mxu0 %v1956_v13 }
  0xc9   :  { %v1369_v16 = vmul.f32 -1.442695, %v140_v14  ;;  %v142_v17 = vadd.f32 %v141_v15, %v1687_v12  ;;  %v1963_v14 = vld [vmem:[%s3219_s3 + $0x1e8] sm:$0xff]  ;;  %v1970_v15 = vld [vmem:[%s3219_s3 + $0x1e0] sm:$0xff] }
  0xca   :  { %358 = vmatprep.subr.mxu1 %v1963_v14  ;;  %475 = vmatprep.subr.mxu0 %v1963_v14 }
  0xcb   :  { %1429 = vpow2.f32 %v1369_v16  ;;  %v1370_v18 = vmul.f32 -1.442695, %v142_v17  ;;  %v1977_v16 = vld [vmem:[%s3219_s3 + $0x1d8] sm:$0xff]  ;;  %v1984_v17 = vld [vmem:[%s3219_s3 + $0x1d0] sm:$0xff]  ;;  %359 = vmatpush2.msra.mxu1 %v1970_v15  ;;  %476 = vmatpush2.msra.mxu0 %v1970_v15 }
  0xcc   :  { %360 = vmatprep.subr.mxu1 %v1977_v16  ;;  %477 = vmatprep.subr.mxu0 %v1977_v16 }
  0xcd   :  { %1431 = vpow2.f32 %v1370_v18  ;;  %v1991_v18 = vld [vmem:[%s3219_s3 + $0x1c8] sm:$0xff]  ;;  %361 = vmatpush2.msra.mxu1 %v1984_v17  ;;  %478 = vmatpush2.msra.mxu0 %v1984_v17 }
  0xce   :  { %362 = vmatprep.subr.mxu1 %v1991_v18  ;;  %479 = vmatprep.subr.mxu0 %v1991_v18 }
  0xd8   :  { %v1430_v19 = vpop.eup %1429 }
  0xd9   :  { %v279_v20 = vadd.f32 1.0, %v1430_v19  ;;  %v1998_v19 = vld [vmem:[%s3219_s3 + $0x1c0] sm:$0xff] }
  0xda   :  { %v1432_v21 = vpop.eup %1431  ;;  %363 = vmatpush2.msra.mxu1 %v1998_v19  ;;  %480 = vmatpush2.msra.mxu0 %v1998_v19 }
  0xdb   :  { %1433 = vrcp.f32 %v279_v20  ;;  %v280_v22 = vadd.f32 1.0, %v1432_v21  ;;  %v2005_v20 = vld [vmem:[%s3219_s3 + $0x1b8] sm:$0xff]  ;;  %v2012_v21 = vld [vmem:[%s3219_s3 + $0x1b0] sm:$0xff] }
  0xdc   :  { %3325 = vst [vmem:[#allocation10_spill] sm:$0xff] %v2012_v21  ;;  %364 = vmatprep.subr.mxu1 %v2005_v20  ;;  %481 = vmatprep.subr.mxu0 %v2005_v20 }
  0xdd   :  { %1435 = vrcp.f32 %v280_v22  ;;  %v2019_v22 = vld [vmem:[%s3219_s3 + $0x1a8] sm:$0xff]  ;;  %365 = vmatpush2.msra.mxu1 %v2012_v21  ;;  %482 = vmatpush2.msra.mxu0 %v2012_v21 }
  0xde   :  { %3326 = vst [vmem:[#allocation11_spill] sm:$0xff] %v2019_v22  ;;  %366 = vmatprep.subr.mxu1 %v2019_v22  ;;  %483 = vmatprep.subr.mxu0 %v2019_v22 }
  0xdf   :  { %367 = vmatpush2.msra.mxu1 %v2026_v24  ;;  %484 = vmatpush2.msra.mxu0 %v2026_v24 }
  0xe8   :  { %v1434_v25 = vpop.eup %1433 }
  0xe9   :  { %v285_v26 = vmul.f32 2.0, %v1434_v25 }
  0xea   :  { %v1436_v27 = vpop.eup %1435 }
  0xeb   :  { %v1371_v29 = vadd.f32 -1.0, %v285_v26  ;;  %v286_v30 = vmul.f32 2.0, %v1436_v27  ;;  %v2040_v26 = vld [vmem:[%s3219_s3 + $0x190] sm:$0xff] }
  0xec   :  { %3329 = vst [vmem:[#allocation14_spill] sm:$0xff] %v2040_v26 }
  0xed   :  { %v1704_v31 = vsel %vm1698_vm3, %v1371_v29, %v1434_v25  ;;  %v1372_v32 = vadd.f32 -1.0, %v286_v30  ;;  %v2033_v25 = vld [vmem:[%s3219_s3 + $0x198] sm:$0xff]  ;;  %v2054_v29 = vld [vmem:[%s3219_s3 + $0x180] sm:$0xff] }
  0xee   :  { %293 = vrot.lane.b32.xlu0 %v1704_v31, %s1624_s2  ;;  %3328 = vst [vmem:[#allocation13_spill] sm:$0xff] %v2033_v25  ;;  %368 = vmatprep.subr.mxu1 %v2033_v25  ;;  %3331 = vst [vmem:[#allocation16_spill] sm:$0xff] %v2054_v29  ;;  %v2061_v30 = vld [vmem:[%s3219_s3 + $0x178] sm:$0xff] }
  0xef   :  { %v1714_v34 = vsel %vm1708_vm6, %v1372_v32, %v1436_v27  ;;  %v2047_v27 = vld [vmem:[%s3219_s3 + $0x188] sm:$0xff]  ;;  %485 = vmatprep.subr.mxu0 %v2033_v25  ;;  %369 = vmatpush2.msra.mxu1 %v2040_v26  ;;  %3332 = vst [vmem:[#allocation17_spill] sm:$0xff] %v2061_v30  ;;  %v2068_v32 = vld [vmem:[%s3219_s3 + $0x170] sm:$0xff] }
  0xf0   :  { %3330 = vst [vmem:[#allocation15_spill] sm:$0xff] %v2047_v27  ;;  %486 = vmatpush2.msra.mxu0 %v2040_v26  ;;  %370 = vmatprep.subr.mxu1 %v2047_v27  ;;  %3333 = vst [vmem:[#allocation18_spill] sm:$0xff] %v2068_v32  ;;  %v292_v12 = vmul.f32 0.0, %v1714_v34 }
  0xf1   :  { %487 = vmatprep.subr.mxu0 %v2047_v27  ;;  %371 = vmatpush2.msra.mxu1 %v2054_v29 }
  0xf2   :  { %295 = vrot.lane.b32.xlu0 %v1714_v34, %s1624_s2  ;;  %488 = vmatpush2.msra.mxu0 %v2054_v29 }
  0xf3   :  { %372 = vmatprep.subr.mxu1 %v2061_v30  ;;  %489 = vmatprep.subr.mxu0 %v2061_v30 }
  0xf4   :  { %373 = vmatpush2.msra.mxu1 %v2068_v32  ;;  %490 = vmatpush2.msra.mxu0 %v2068_v32 }
 0x160   :  { %v294_v35 = vpop.permute.xlu0 %293 }
 0x164   :  { %v296_v36 = vpop.permute.xlu0 %295 }
 0x165   :  { %v299_v37 = vsel %vm297_vm7, %v296_v36, %v294_v35  ;;  %v298_v39 = vsel %vm297_vm7, %v294_v35, %v296_v36  ;;  %v2075_v35 = vld [vmem:[%s3219_s3 + $0x168] sm:$0xff]  ;;  %v2082_v36 = vld [vmem:[%s3219_s3 + $0x160] sm:$0xff] }
 0x166   :  { %v300_v38 = vmul.f32 %v299_v37, %v1704_v31  ;;  %v301_v40 = vmul.f32 %v298_v39, %v1714_v34  ;;  %3334 = vst [vmem:[#allocation19_spill] sm:$0xff] %v2075_v35  ;;  %3335 = vst [vmem:[#allocation20_spill] sm:$0xff] %v2082_v36  ;;  %v2089_v37 = vld [vmem:[%s3219_s3 + $0x158] sm:$0xff]  ;;  %374 = vmatprep.subr.mxu1 %v2075_v35  ;;  %491 = vmatprep.subr.mxu0 %v2075_v35  ;;  %v2103_v39 = vld [vmem:[%s3219_s3 + $0x148] sm:$0xff] }
 0x167   :  { %3336 = vst [vmem:[#allocation21_spill] sm:$0xff] %v2089_v37  ;;  %375 = vmatpush2.msra.mxu1 %v2082_v36  ;;  %3338 = vst [vmem:[#allocation23_spill] sm:$0xff] %v2103_v39  ;;  %492 = vmatpush2.msra.mxu0 %v2082_v36 }
 0x168   :  { %302 = vrot.lane.b32.xlu1 %v300_v38, %s1625_s8  ;;  %v2096_v38 = vld [vmem:[%s3219_s3 + $0x150] sm:$0xff]  ;;  %376 = vmatprep.subr.mxu1 %v2089_v37 }
 0x169   :  { %3337 = vst [vmem:[#allocation22_spill] sm:$0xff] %v2096_v38  ;;  %493 = vmatprep.subr.mxu0 %v2089_v37  ;;  %377 = vmatpush2.msra.mxu1 %v2096_v38 }
 0x16a   :  { %494 = vmatpush2.msra.mxu0 %v2096_v38  ;;  %378 = vmatprep.subr.mxu1 %v2103_v39  ;;  %v291_v38 = vmul.f32 0.0, %v1704_v31 }
 0x16b   :  { %495 = vmatprep.subr.mxu0 %v2103_v39 }
 0x16c   :  { %304 = vrot.lane.b32.xlu1 %v301_v40, %s1625_s8  ;;  %v2110_v40 = vld [vmem:[%s3219_s3 + $0x140] sm:$0xff] }
 0x16d   :  { %3339 = vst [vmem:[#allocation24_spill] sm:$0xff] %v2110_v40  ;;  %379 = vmatpush2.msra.mxu1 %v2110_v40  ;;  %496 = vmatpush2.msra.mxu0 %v2110_v40 }
 0x16e   :  { %380 = vmatprep.subr.mxu1 %v2117_v4  ;;  %497 = vmatprep.subr.mxu0 %v2117_v4  ;;  %v2154_v4 = vld [vmem:[%s3219_s3 + $0x120] sm:$0xff] }
 0x16f   :  { %381 = vmatpush2.msra.mxu1 %v2124_v33  ;;  %498 = vmatpush2.msra.mxu0 %v2124_v33  ;;  %v2148_v33 = vld [vmem:[%s3219_s3 + $0x128] sm:$0xff]  ;;  %3345 = vst [vmem:[#allocation30_spill] sm:$0xff] %v2154_v4 }
 0x170   :  { %3344 = vst [vmem:[#allocation29_spill] sm:$0xff] %v2148_v33  ;;  %382 = vmatprep.subr.mxu1 %v2148_v33  ;;  %499 = vmatprep.subr.mxu0 %v2148_v33 }
 0x171   :  { %383 = vmatpush2.msra.mxu1 %v2154_v4  ;;  %500 = vmatpush2.msra.mxu0 %v2154_v4 }
 0x1da   :  { %v303_v28 = vpop.permute.xlu1 %302 }
 0x1de   :  { %v305_v11 = vpop.permute.xlu1 %304 }
 0x1df   :  { %v306_v39 = vsel %vm255_vm2, %v303_v28, %v305_v11  ;;  %v307_v40 = vsel %vm255_vm2, %v305_v11, %v303_v28  ;;  %v25_v11 = vld [vmem:[%s3216_s0 + $0x8] sm:$0xff]  ;;  %v2169_v28 = vld [vmem:[%s3219_s3 + $0x110] sm:$0xff] }
 0x1e0   :  { %v2139_v37 = vadd.f32 %v306_v39, %v291_v38  ;;  %v2141_v36 = vadd.f32 %v307_v40, %v292_v12  ;;  %v2164_v12 = vld [vmem:[%s3219_s3 + $0x118] sm:$0xff]  ;;  %3347 = vst [vmem:[#allocation32_spill] sm:$0xff] %v2169_v28  ;;  %1362 = vmatmul.mubr.msk.f32.gmra.mxu0 %vm48_vm0, %v25_v11  ;;  %v2177_v38 = vld [vmem:[%s3219_s3 + $0x108] sm:$0xff]  ;;  %v2182_v39 = vld [vmem:[%s3219_s3 + $0x100] sm:$0xff]  ;;  %v3350_v40 = vmov 0.0  }
 0x1e1   :  { %3346 = vst [vmem:[#allocation31_spill] sm:$0xff] %v2164_v12  ;;  %384 = vmatprep.subr.mxu1 %v2164_v12  ;;  %3348 = vst [vmem:[#allocation33_spill] sm:$0xff] %v2177_v38  ;;  %149 = vmatprep.mubr.f32.mxu0 %v3350_v40 }
 0x1e2   :  { %3342 = vst [vmem:[#allocation27_spill] sm:$0xff] %v2139_v37  ;;  %3343 = vst [vmem:[#allocation28_spill] sm:$0xff] %v2141_v36  ;;  %1437 = vtanh.f32 %v2139_v37  ;;  %385 = vmatpush2.msra.mxu1 %v2169_v28  ;;  %501 = vmatprep.subr.mxu0 %v2164_v12 }
 0x1e3   :  { %1439 = vtanh.f32 %v2141_v36  ;;  %3349 = vst [vmem:[#allocation34_spill] sm:$0xff] %v2182_v39  ;;  %386 = vmatprep.subr.mxu1 %v2177_v38  ;;  %502 = vmatpush2.msra.mxu0 %v2169_v28 }
 0x1e4   :  { %387 = vmatpush2.msra.mxu1 %v2182_v39  ;;  %503 = vmatprep.subr.mxu0 %v2177_v38 }
 0x1e5   :  { %558 = vmatprep.subr.mxu1 %v1730_v41  ;;  %504 = vmatpush2.msra.mxu0 %v2182_v39 }
 0x1e6   :  { %675 = vmatprep.subr.mxu0 %v1730_v41 }
 0x1ef   :  { %v1438_v11 = vpop.eup %1437 }
 0x1f0   :  { %v1440_v37 = vpop.eup %1439  ;;  %312 = vrot.lane.b32.xlu0 %v1438_v11, %s1624_s2  ;;  %v3361_v11 = vld [vmem:[#allocation33_spill] sm:$0xff] }
 0x1f1   :  { %314 = vrot.lane.b32.xlu1 %v1440_v37, %s1624_s2  ;;  %v3355_v37 = vld [vmem:[#allocation24_spill] sm:$0xff] }
 0x262   :  { %v313_v36 = vpop.permute.xlu0 %312 }
 0x263   :  { %v315_v40 = vpop.permute.xlu1 %314 }
 0x264   :  { %v316_v12 = vsel %vm297_vm7, %v313_v36, %v315_v40  ;;  %v317_v38 = vsel %vm297_vm7, %v315_v40, %v313_v36  ;;  %v3354_v36 = vld [vmem:[#allocation23_spill] sm:$0xff]  ;;  %v3360_v40 = vld [vmem:[#allocation32_spill] sm:$0xff] }
 0x265   :  { %v319_v28 = vmul.f32 %v316_v12, %v1714_v34  ;;  %v318_v39 = vmul.f32 %v317_v38, %v1704_v31  ;;  %v3352_v31 = vld [vmem:[#allocation21_spill] sm:$0xff]  ;;  %v3353_v34 = vld [vmem:[#allocation22_spill] sm:$0xff] }
 0x266   :  { %v3356_v12 = vld [vmem:[#allocation25_spill] sm:$0xff]  ;;  %v3358_v38 = vld [vmem:[#allocation30_spill] sm:$0xff] }
 0x267   :  { %v321_v4 = vmul.f32 0.0, %v319_v28  ;;  %v3357_v28 = vld [vmem:[#allocation26_spill] sm:$0xff] }
 0x269   :  { %388 = vmatprep.mubr.f32.mxu1 %v321_v4  ;;  %v3351_v4 = vld [vmem:[#allocation20_spill] sm:$0xff] }
 0x26a   :  { %389 = vmatmul.mubr.f32.vlgmr.msra.gmra.mxu1 %v318_v39  ;;  %v3359_v39 = vld [vmem:[#allocation31_spill] sm:$0xff] }
 0x26b   :  { %559 = vmatpush1.msra.mxu1 %v1735_v42 }
 0x26c   :  { %560 = vmatprep.subr.mxu1 %v1740_v43 }
 0x26d   :  { %561 = vmatpush1.msra.mxu1 %v1746_v44 }
 0x26e   :  { %562 = vmatprep.subr.mxu1 %v1753_v45 }
 0x26f   :  { %563 = vmatpush1.msra.mxu1 %v1760_v46 }
 0x270   :  { %564 = vmatprep.subr.mxu1 %v1767_v47 }
 0x271   :  { %565 = vmatpush1.msra.mxu1 %v1774_v48 }
 0x272   :  { %566 = vmatprep.subr.mxu1 %v1781_v49 }
 0x273   :  { %567 = vmatpush1.msra.mxu1 %v1788_v50 }
 0x274   :  { %568 = vmatprep.subr.mxu1 %v1795_v51 }
 0x275   :  { %569 = vmatpush1.msra.mxu1 %v1802_v52 }
 0x276   :  { %570 = vmatprep.subr.mxu1 %v1809_v53 }
 0x277   :  { %571 = vmatpush1.msra.mxu1 %v1816_v54 }
 0x278   :  { %572 = vmatprep.subr.mxu1 %v1823_v55 }
 0x279   :  { %573 = vmatpush1.msra.mxu1 %v1830_v56 }
 0x27a   :  { %574 = vmatprep.subr.mxu1 %v1837_v57 }
 0x27b   :  { %575 = vmatpush1.msra.mxu1 %v1844_v58 }
 0x27c   :  { %576 = vmatprep.subr.mxu1 %v1851_v59 }
 0x27d   :  { %577 = vmatpush1.msra.mxu1 %v1858_v60 }
 0x27e   :  { %578 = vmatprep.subr.mxu1 %v1865_v61 }
 0x27f   :  { %579 = vmatpush1.msra.mxu1 %v1872_v62 }
 0x280   :  { %580 = vmatprep.subr.mxu1 %v1879_v63 }
 0x281   :  { %581 = vmatpush1.msra.mxu1 %v1886_v0 }
 0x282   :  { %582 = vmatprep.subr.mxu1 %v1893_v1 }
 0x283   :  { %583 = vmatpush1.msra.mxu1 %v1900_v2 }
 0x284   :  { %584 = vmatprep.subr.mxu1 %v1907_v3 }
 0x285   :  { %585 = vmatpush1.msra.mxu1 %v1914_v5 }
 0x286   :  { %586 = vmatprep.subr.mxu1 %v1921_v6 }
 0x287   :  { %587 = vmatpush1.msra.mxu1 %v1928_v7 }
 0x288   :  { %588 = vmatprep.subr.mxu1 %v1935_v8 }
 0x289   :  { %589 = vmatpush1.msra.mxu1 %v1942_v9 }
 0x28a   :  { %590 = vmatprep.subr.mxu1 %v1949_v10 }
 0x28b   :  { %591 = vmatpush2.msra.mxu1 %v1956_v13 }
 0x28c   :  { %592 = vmatprep.subr.mxu1 %v1963_v14 }
 0x28d   :  { %593 = vmatpush2.msra.mxu1 %v1970_v15 }
 0x28e   :  { %594 = vmatprep.subr.mxu1 %v1977_v16 }
 0x28f   :  { %595 = vmatpush2.msra.mxu1 %v1984_v17 }
 0x290   :  { %596 = vmatprep.subr.mxu1 %v1991_v18 }
 0x291   :  { %597 = vmatpush2.msra.mxu1 %v1998_v19 }
 0x292   :  { %598 = vmatprep.subr.mxu1 %v2005_v20 }
 0x293   :  { %599 = vmatpush2.msra.mxu1 %v2012_v21 }
 0x294   :  { %600 = vmatprep.subr.mxu1 %v2019_v22 }
 0x295   :  { %601 = vmatpush2.msra.mxu1 %v2026_v24 }
 0x296   :  { %602 = vmatprep.subr.mxu1 %v2033_v25 }
 0x297   :  { %603 = vmatpush2.msra.mxu1 %v2040_v26 }
 0x298   :  { %604 = vmatprep.subr.mxu1 %v2047_v27 }
 0x299   :  { %605 = vmatpush2.msra.mxu1 %v2054_v29 }
 0x29a   :  { %606 = vmatprep.subr.mxu1 %v2061_v30 }
 0x29b   :  { %607 = vmatpush2.msra.mxu1 %v2068_v32 }
 0x29c   :  { %608 = vmatprep.subr.mxu1 %v2075_v35 }
 0x29d   :  { %609 = vmatpush2.msra.mxu1 %v3351_v4 }
 0x29e   :  { %610 = vmatprep.subr.mxu1 %v3352_v31  ;;  %v3362_v31 = vld [vmem:[#allocation34_spill] sm:$0xff] }
 0x29f   :  { %611 = vmatpush2.msra.mxu1 %v3353_v34 }
 0x2a0   :  { %612 = vmatprep.subr.mxu1 %v3354_v36  ;;  %v145_v36 = vpop.f32.mrf.mxu0 }
 0x2a1   :  { %613 = vmatpush2.msra.mxu1 %v3355_v37  ;;  %v3363_v37 = vld [vmem:[#allocation5_spill] sm:$0xff] }
 0x2a2   :  { %614 = vmatprep.subr.mxu1 %v3356_v12  ;;  %v146_v34 = vadd.f32 %v145_v36, %v3363_v37  ;;  %v147_v12 = vpop.f32.mrf.mxu0 }
 0x2a3   :  { %615 = vmatpush2.msra.mxu1 %v3357_v28  ;;  %v3364_v28 = vld [vmem:[#allocation6_spill] sm:$0xff] }
 0x2a4   :  { %616 = vmatprep.subr.mxu1 %v2148_v33  ;;  %v148_v35 = vadd.f32 %v147_v12, %v3364_v28 }
 0x2a5   :  { %617 = vmatpush2.msra.mxu1 %v3358_v38 }
 0x2a6   :  { %618 = vmatprep.subr.mxu1 %v3359_v39 }
 0x2a7   :  { %619 = vmatpush2.msra.mxu1 %v3360_v40 }
 0x2a8   :  { %620 = vmatprep.subr.mxu1 %v3361_v11 }
 0x2a9   :  { %621 = vmatpush2.msra.mxu1 %v3362_v31 }
 0x2aa   :  { %792 = vmatprep.subr.mxu1 %v1730_v41 }
 0x32a   :  { %v390_v4 = vpop.f32.mrf.mxu1 }
 0x32b   :  { %v391_v33 = vadd.f32 %v390_v4, %v146_v34 }
 0x32c   :  { %v392_v32 = vpop.f32.mrf.mxu1 }
 0x32d   :  { %v1373_v38 = vmul.f32 -1.442695, %v391_v33  ;;  %v393_v30 = vadd.f32 %v392_v32, %v148_v35 }
 0x32f   :  { %1441 = vpow2.f32 %v1373_v38  ;;  %v1374_v39 = vmul.f32 -1.442695, %v393_v30  ;;  %v28_v38 = vld [vmem:[%s3216_s0 + $0x20] sm:$0xff] }
 0x331   :  { %1443 = vpow2.f32 %v1374_v39  ;;  %v29_v39 = vld [vmem:[%s3216_s0 + $0x28] sm:$0xff] }
 0x33c   :  { %v1442_v40 = vpop.eup %1441 }
 0x33d   :  { %v401_v11 = vadd.f32 1.0, %v1442_v40  ;;  %v30_v40 = vld [vmem:[%s3216_s0 + $0x30] sm:$0xff] }
 0x33e   :  { %v1444_v29 = vpop.eup %1443 }
 0x33f   :  { %1445 = vrcp.f32 %v401_v11  ;;  %v402_v31 = vadd.f32 1.0, %v1444_v29  ;;  %v31_v11 = vld [vmem:[%s3216_s0 + $0x38] sm:$0xff] }
 0x341   :  { %1447 = vrcp.f32 %v402_v31 }
 0x34c   :  { %v1446_v41 = vpop.eup %1445 }
 0x34d   :  { %v407_v27 = vmul.f32 2.0, %v1446_v41 }
 0x34e   :  { %v1448_v36 = vpop.eup %1447 }
 0x34f   :  { %v1375_v37 = vadd.f32 -1.0, %v407_v27  ;;  %v408_v26 = vmul.f32 2.0, %v1448_v36 }
 0x351   :  { %v411_v4 = vsel %vm1698_vm3, %v1375_v37, %v1446_v41  ;;  %v1376_v34 = vadd.f32 -1.0, %v408_v26  ;;  %v26_v41 = vld [vmem:[%s3216_s0 + $0x10] sm:$0xff]  ;;  %v3367_v26 = vmov 0.0   ;;  %v27_v37 = vld [vmem:[%s3216_s0 + $0x18] sm:$0xff] }
 0x352   :  { %415 = vrot.lane.b32.xlu0 %v411_v4, %s1624_s2  ;;  %1363 = vmatmul.mubr.msk.f32.gmra.mxu0 %vm48_vm0, %v26_v41 }
 0x353   :  { %v412_v30 = vsel %vm1708_vm6, %v1376_v34, %v1448_v36  ;;  %155 = vmatprep.mubr.f32.mxu0 %v3367_v26  ;;  %v3368_v36 = vld [vmem:[#allocation28_spill] sm:$0xff] }
 0x354   :  { %417 = vrot.lane.b32.xlu1 %v412_v30, %s1624_s2  ;;  %v323_v34 = vmul.f32 0.0, %v3368_v36 }
 0x356   :  { %1364 = vmatmul.mubr.msk.f32.gmra.mxu0 %vm48_vm0, %v27_v37 }
 0x357   :  { %161 = vmatprep.mubr.f32.mxu0 %v3367_v26 }
 0x35a   :  { %1365 = vmatmul.mubr.msk.f32.gmra.mxu0 %vm48_vm0, %v28_v38 }
 0x35b   :  { %167 = vmatprep.mubr.f32.mxu0 %v3367_v26 }
 0x35e   :  { %1366 = vmatmul.mubr.msk.f32.gmra.mxu0 %vm48_vm0, %v29_v39 }
 0x35f   :  { %173 = vmatprep.mubr.f32.mxu0 %v3367_v26 }
 0x362   :  { %1367 = vmatmul.mubr.msk.f32.gmra.mxu0 %vm48_vm0, %v30_v40 }
 0x363   :  { %179 = vmatprep.mubr.f32.mxu0 %v3367_v26  ;;  %v3384_v26 = vld [vmem:[#allocation29_spill] sm:$0xff] }
 0x366   :  { %1368 = vmatmul.mubr.msk.f32.gmra.mxu0 %vm48_vm0, %v31_v11 }
 0x3c4   :  { %v416_v32 = vpop.permute.xlu0 %415 }
 0x3c6   :  { %v418_v35 = vpop.permute.xlu1 %417 }
 0x3c7   :  { %v419_v29 = vsel %vm297_vm7, %v416_v32, %v418_v35  ;;  %v420_v27 = vsel %vm297_vm7, %v418_v35, %v416_v32  ;;  %v414_v35 = vmul.f32 %v412_v30, %v323_v34 }
 0x3c8   :  { %v421_v31 = vmul.f32 %v420_v27, %v411_v4  ;;  %v422_v12 = vmul.f32 %v419_v29, %v412_v30  ;;  %v3369_v27 = vld [vmem:[#allocation27_spill] sm:$0xff] }
 0x3ca   :  { %423 = vrot.lane.b32.xlu0 %v421_v31, %s1625_s8  ;;  %425 = vrot.lane.b32.xlu1 %v422_v12, %s1625_s8  ;;  %v413_v31 = vmul.f32 %v411_v4, %v3369_v27  ;;  %v3372_v27 = vld [vmem:[#allocation15_spill] sm:$0xff] }
 0x43c   :  { %v424_v32 = vpop.permute.xlu0 %423  ;;  %v426_v29 = vpop.permute.xlu1 %425 }
 0x43d   :  { %v427_v12 = vsel %vm255_vm2, %v424_v32, %v426_v29  ;;  %v428_v41 = vsel %vm255_vm2, %v426_v29, %v424_v32 }
 0x43e   :  { %v2315_v37 = vadd.f32 %v427_v12, %v413_v31  ;;  %v2317_v38 = vadd.f32 %v428_v41, %v414_v35  ;;  %v3373_v31 = vld [vmem:[#allocation16_spill] sm:$0xff]  ;;  %v3374_v12 = vld [vmem:[#allocation17_spill] sm:$0xff]  ;;  %v3375_v41 = vld [vmem:[#allocation18_spill] sm:$0xff] }
 0x440   :  { %1449 = vtanh.f32 %v2315_v37 }
 0x441   :  { %1451 = vtanh.f32 %v2317_v38 }
 0x44d   :  { %v1450_v39 = vpop.eup %1449 }
 0x44e   :  { %v1452_v40 = vpop.eup %1451  ;;  %433 = vrot.lane.b32.xlu0 %v1450_v39, %s1624_s2  ;;  %v3376_v39 = vld [vmem:[#allocation19_spill] sm:$0xff] }
 0x44f   :  { %435 = vrot.lane.b32.xlu1 %v1452_v40, %s1624_s2  ;;  %v3377_v40 = vld [vmem:[#allocation20_spill] sm:$0xff] }
 0x4c0   :  { %v434_v11 = vpop.permute.xlu0 %433 }
 0x4c1   :  { %v436_v36 = vpop.permute.xlu1 %435 }
 0x4c2   :  { %v437_v34 = vsel %vm297_vm7, %v434_v11, %v436_v36  ;;  %v438_v32 = vsel %vm297_vm7, %v436_v36, %v434_v11  ;;  %v3378_v11 = vld [vmem:[#allocation21_spill] sm:$0xff]  ;;  %v3379_v36 = vld [vmem:[#allocation22_spill] sm:$0xff] }
 0x4c3   :  { %v439_v35 = vmul.f32 %v438_v32, %v411_v4  ;;  %v440_v29 = vmul.f32 %v437_v34, %v412_v30  ;;  %v3370_v4 = vld [vmem:[#allocation13_spill] sm:$0xff]  ;;  %v3371_v30 = vld [vmem:[#allocation14_spill] sm:$0xff]  ;;  %v3380_v34 = vld [vmem:[#allocation23_spill] sm:$0xff] }
 0x4c4   :  { %v3381_v32 = vld [vmem:[#allocation24_spill] sm:$0xff] }
 0x4c5   :  { %505 = vmatprep.mubr.f32.mxu0 %v440_v29  ;;  %v3383_v29 = vld [vmem:[#allocation26_spill] sm:$0xff] }
 0x4c6   :  { %506 = vmatmul.mubr.f32.vlgmr.msra.gmra.mxu0 %v439_v35  ;;  %v3382_v35 = vld [vmem:[#allocation25_spill] sm:$0xff] }
 0x4c7   :  { %676 = vmatpush1.msra.mxu0 %v1735_v42 }
 0x4c8   :  { %677 = vmatprep.subr.mxu0 %v1740_v43 }
 0x4c9   :  { %678 = vmatpush1.msra.mxu0 %v1746_v44 }
 0x4ca   :  { %679 = vmatprep.subr.mxu0 %v1753_v45 }
 0x4cb   :  { %680 = vmatpush1.msra.mxu0 %v1760_v46 }
 0x4cc   :  { %681 = vmatprep.subr.mxu0 %v1767_v47 }
 0x4cd   :  { %682 = vmatpush1.msra.mxu0 %v1774_v48 }
 0x4ce   :  { %683 = vmatprep.subr.mxu0 %v1781_v49 }
 0x4cf   :  { %684 = vmatpush1.msra.mxu0 %v1788_v50 }
 0x4d0   :  { %685 = vmatprep.subr.mxu0 %v1795_v51 }
 0x4d1   :  { %686 = vmatpush1.msra.mxu0 %v1802_v52 }
 0x4d2   :  { %687 = vmatprep.subr.mxu0 %v1809_v53 }
 0x4d3   :  { %688 = vmatpush1.msra.mxu0 %v1816_v54 }
 0x4d4   :  { %689 = vmatprep.subr.mxu0 %v1823_v55 }
 0x4d5   :  { %690 = vmatpush1.msra.mxu0 %v1830_v56 }
 0x4d6   :  { %691 = vmatprep.subr.mxu0 %v1837_v57 }
 0x4d7   :  { %692 = vmatpush1.msra.mxu0 %v1844_v58 }
 0x4d8   :  { %693 = vmatprep.subr.mxu0 %v1851_v59 }
 0x4d9   :  { %694 = vmatpush1.msra.mxu0 %v1858_v60 }
 0x4da   :  { %695 = vmatprep.subr.mxu0 %v1865_v61 }
 0x4db   :  { %696 = vmatpush1.msra.mxu0 %v1872_v62 }
 0x4dc   :  { %697 = vmatprep.subr.mxu0 %v1879_v63 }
 0x4dd   :  { %698 = vmatpush1.msra.mxu0 %v1886_v0 }
 0x4de   :  { %699 = vmatprep.subr.mxu0 %v1893_v1 }
 0x4df   :  { %700 = vmatpush1.msra.mxu0 %v1900_v2 }
 0x4e0   :  { %701 = vmatprep.subr.mxu0 %v1907_v3 }
 0x4e1   :  { %702 = vmatpush1.msra.mxu0 %v1914_v5 }
 0x4e2   :  { %703 = vmatprep.subr.mxu0 %v1921_v6 }
 0x4e3   :  { %704 = vmatpush1.msra.mxu0 %v1928_v7 }
 0x4e4   :  { %705 = vmatprep.subr.mxu0 %v1935_v8 }
 0x4e5   :  { %706 = vmatpush1.msra.mxu0 %v1942_v9 }
 0x4e6   :  { %707 = vmatprep.subr.mxu0 %v1949_v10 }
 0x4e7   :  { %708 = vmatpush2.msra.mxu0 %v1956_v13 }
 0x4e8   :  { %709 = vmatprep.subr.mxu0 %v1963_v14 }
 0x4e9   :  { %710 = vmatpush2.msra.mxu0 %v1970_v15 }
 0x4ea   :  { %711 = vmatprep.subr.mxu0 %v1977_v16 }
 0x4eb   :  { %712 = vmatpush2.msra.mxu0 %v1984_v17 }
 0x4ec   :  { %713 = vmatprep.subr.mxu0 %v1991_v18 }
 0x4ed   :  { %714 = vmatpush2.msra.mxu0 %v1998_v19 }
 0x4ee   :  { %715 = vmatprep.subr.mxu0 %v2005_v20 }
 0x4ef   :  { %716 = vmatpush2.msra.mxu0 %v2012_v21 }
 0x4f0   :  { %717 = vmatprep.subr.mxu0 %v2019_v22 }
 0x4f1   :  { %718 = vmatpush2.msra.mxu0 %v2026_v24 }
 0x4f2   :  { %719 = vmatprep.subr.mxu0 %v3370_v4 }
 0x4f3   :  { %720 = vmatpush2.msra.mxu0 %v3371_v30 }
 0x4f4   :  { %721 = vmatprep.subr.mxu0 %v3372_v27  ;;  %v3401_v27 = vld [vmem:[#allocation5_spill] sm:$0xff] }
 0x4f5   :  { %722 = vmatpush2.msra.mxu0 %v3373_v31 }
 0x4f6   :  { %723 = vmatprep.subr.mxu0 %v3374_v12  ;;  %v3385_v12 = vld [vmem:[#allocation30_spill] sm:$0xff] }
 0x4f7   :  { %724 = vmatpush2.msra.mxu0 %v3375_v41  ;;  %v3386_v41 = vld [vmem:[#allocation31_spill] sm:$0xff] }
 0x4f8   :  { %725 = vmatprep.subr.mxu0 %v3376_v39  ;;  %v3387_v39 = vld [vmem:[#allocation32_spill] sm:$0xff] }
 0x4f9   :  { %726 = vmatpush2.msra.mxu0 %v3377_v40  ;;  %v3388_v40 = vld [vmem:[#allocation33_spill] sm:$0xff] }
 0x4fa   :  { %727 = vmatprep.subr.mxu0 %v3378_v11  ;;  %v3389_v11 = vld [vmem:[#allocation34_spill] sm:$0xff] }
 0x4fb   :  { %728 = vmatpush2.msra.mxu0 %v3379_v36  ;;  %v3390_v36 = vld [vmem:[#allocation9_spill] sm:$0xff] }
 0x4fc   :  { %729 = vmatprep.subr.mxu0 %v3380_v34  ;;  %v151_v34 = vpop.f32.mrf.mxu0 }
 0x4fd   :  { %730 = vmatpush2.msra.mxu0 %v3381_v32 }
 0x4fe   :  { %731 = vmatprep.subr.mxu0 %v3382_v35  ;;  %v153_v32 = vpop.f32.mrf.mxu0 }
 0x4ff   :  { %732 = vmatpush2.msra.mxu0 %v3383_v29 }
 0x500   :  { %733 = vmatprep.subr.mxu0 %v3384_v26  ;;  %v2391_v31 = vpop.f32.mrf.mxu0 }
 0x501   :  { %734 = vmatpush2.msra.mxu0 %v3385_v12  ;;  %3391 = vst [vmem:[#allocation6_spill] sm:$0xff] %v2391_v31  ;;  %v152_v31 = vadd.f32 %v151_v34, %v3401_v27 }
 0x502   :  { %735 = vmatprep.subr.mxu0 %v3386_v41  ;;  %v2393_v35 = vpop.f32.mrf.mxu0 }
 0x503   :  { %736 = vmatpush2.msra.mxu0 %v3387_v39  ;;  %3392 = vst [vmem:[#allocation7_spill] sm:$0xff] %v2393_v35  ;;  %v154_v35 = vadd.f32 %v153_v32, %v3364_v28 }
 0x504   :  { %737 = vmatprep.subr.mxu0 %v3388_v40  ;;  %v2395_v29 = vpop.f32.mrf.mxu0 }
 0x505   :  { %738 = vmatpush2.msra.mxu0 %v3389_v11  ;;  %3393 = vst [vmem:[#allocation8_spill] sm:$0xff] %v2395_v29 }
 0x506   :  { %909 = vmatprep.subr.mxu0 %v3390_v36  ;;  %v2397_v26 = vpop.f32.mrf.mxu0 }
 0x507   :  { %3394 = vst [vmem:[#allocation28_spill] sm:$0xff] %v2397_v26 }
 0x508   :  { %v2399_v12 = vpop.f32.mrf.mxu0 }
 0x509   :  { %3395 = vst [vmem:[#allocation27_spill] sm:$0xff] %v2399_v12 }
 0x50a   :  { %v2401_v41 = vpop.f32.mrf.mxu0 }
 0x50b   :  { %3396 = vst [vmem:[#allocation9_spill] sm:$0xff] %v2401_v41 }
 0x50c   :  { %v2403_v39 = vpop.f32.mrf.mxu0 }
 0x50d   :  { %3397 = vst [vmem:[#allocation35_spill] sm:$0xff] %v2403_v39 }
 0x50e   :  { %v2405_v40 = vpop.f32.mrf.mxu0 }
 0x50f   :  { %3398 = vst [vmem:[#allocation36_spill] sm:$0xff] %v2405_v40 }
 0x510   :  { %v2407_v11 = vpop.f32.mrf.mxu0 }
 0x511   :  { %3399 = vst [vmem:[#allocation37_spill] sm:$0xff] %v2407_v11 }
 0x512   :  { %v2409_v36 = vpop.f32.mrf.mxu0 }
 0x513   :  { %3400 = vst [vmem:[#allocation38_spill] sm:$0xff] %v2409_v36 }
 0x586   :  { %v507_v30 = vpop.f32.mrf.mxu0 }
 0x587   :  { %v508_v29 = vadd.f32 %v507_v30, %v152_v31 }
 0x588   :  { %v509_v4 = vpop.f32.mrf.mxu0 }
 0x589   :  { %v1377_v26 = vmul.f32 -1.442695, %v508_v29  ;;  %v510_v24 = vadd.f32 %v509_v4, %v154_v35 }
 0x58b   :  { %1453 = vpow2.f32 %v1377_v26  ;;  %v1378_v12 = vmul.f32 -1.442695, %v510_v24 }
 0x58d   :  { %1455 = vpow2.f32 %v1378_v12 }
 0x598   :  { %v1454_v41 = vpop.eup %1453 }
 0x599   :  { %v518_v39 = vadd.f32 1.0, %v1454_v41 }
 0x59a   :  { %v1456_v22 = vpop.eup %1455 }
 0x59b   :  { %1457 = vrcp.f32 %v518_v39  ;;  %v519_v40 = vadd.f32 1.0, %v1456_v22 }
 0x59d   :  { %1459 = vrcp.f32 %v519_v40 }
 0x5a8   :  { %v1458_v11 = vpop.eup %1457 }
 0x5a9   :  { %v524_v36 = vmul.f32 2.0, %v1458_v11 }
 0x5aa   :  { %v1460_v21 = vpop.eup %1459 }
 0x5ab   :  { %v1379_v34 = vadd.f32 -1.0, %v524_v36  ;;  %v525_v27 = vmul.f32 2.0, %v1460_v21 }
 0x5ad   :  { %v528_v30 = vsel %vm1698_vm3, %v1379_v34, %v1458_v11  ;;  %v1380_v31 = vadd.f32 -1.0, %v525_v27 }
 0x5ae   :  { %532 = vrot.lane.b32.xlu0 %v528_v30, %s1624_s2  ;;  %v530_v11 = vmul.f32 %v528_v30, %v2315_v37 }
 0x5af   :  { %v529_v24 = vsel %vm1708_vm6, %v1380_v31, %v1460_v21 }
 0x5b0   :  { %534 = vrot.lane.b32.xlu1 %v529_v24, %s1624_s2  ;;  %v531_v40 = vmul.f32 %v529_v24, %v2317_v38 }
 0x620   :  { %v533_v26 = vpop.permute.xlu0 %532 }
 0x622   :  { %v535_v4 = vpop.permute.xlu1 %534 }
 0x623   :  { %v536_v22 = vsel %vm297_vm7, %v533_v26, %v535_v4  ;;  %v537_v12 = vsel %vm297_vm7, %v535_v4, %v533_v26 }
 0x624   :  { %v538_v41 = vmul.f32 %v537_v12, %v528_v30  ;;  %v539_v39 = vmul.f32 %v536_v22, %v529_v24 }
 0x626   :  { %540 = vrot.lane.b32.xlu0 %v538_v41, %s1625_s8  ;;  %542 = vrot.lane.b32.xlu1 %v539_v39, %s1625_s8 }
 0x698   :  { %v541_v27 = vpop.permute.xlu0 %540  ;;  %v543_v21 = vpop.permute.xlu1 %542 }
 0x699   :  { %v544_v32 = vsel %vm255_vm2, %v541_v27, %v543_v21  ;;  %v545_v35 = vsel %vm255_vm2, %v543_v21, %v541_v27 }
 0x69a   :  { %v2431_v29 = vadd.f32 %v544_v32, %v530_v11  ;;  %v2433_v36 = vadd.f32 %v545_v35, %v531_v40 }
 0x69c   :  { %1461 = vtanh.f32 %v2431_v29 }
 0x69d   :  { %1463 = vtanh.f32 %v2433_v36 }
 0x6a9   :  { %v1462_v34 = vpop.eup %1461 }
 0x6aa   :  { %v1464_v31 = vpop.eup %1463  ;;  %550 = vrot.lane.b32.xlu0 %v1462_v34, %s1624_s2 }
 0x6ab   :  { %552 = vrot.lane.b32.xlu1 %v1464_v31, %s1624_s2 }
 0x71c   :  { %v551_v37 = vpop.permute.xlu0 %550 }
 0x71d   :  { %v553_v38 = vpop.permute.xlu1 %552 }
 0x71e   :  { %v554_v26 = vsel %vm297_vm7, %v551_v37, %v553_v38  ;;  %v555_v4 = vsel %vm297_vm7, %v553_v38, %v551_v37 }
 0x71f   :  { %v556_v22 = vmul.f32 %v555_v4, %v528_v30  ;;  %v557_v12 = vmul.f32 %v554_v26, %v529_v24 }
 0x721   :  { %622 = vmatprep.mubr.f32.mxu1 %v557_v12 }
 0x722   :  { %623 = vmatmul.mubr.f32.vlgmr.msra.gmra.mxu1 %v556_v22 }
 0x723   :  { %793 = vmatpush1.msra.mxu1 %v1735_v42  ;;  %v3402_v42 = vld [vmem:[#allocation10_spill] sm:$0xff] }
 0x724   :  { %794 = vmatprep.subr.mxu1 %v1740_v43  ;;  %v3403_v43 = vld [vmem:[#allocation11_spill] sm:$0xff] }
 0x725   :  { %795 = vmatpush1.msra.mxu1 %v1746_v44  ;;  %v3404_v44 = vld [vmem:[#allocation12_spill] sm:$0xff] }
 0x726   :  { %796 = vmatprep.subr.mxu1 %v1753_v45  ;;  %v3405_v45 = vld [vmem:[#allocation13_spill] sm:$0xff] }
 0x727   :  { %797 = vmatpush1.msra.mxu1 %v1760_v46  ;;  %v3406_v46 = vld [vmem:[#allocation14_spill] sm:$0xff] }
 0x728   :  { %798 = vmatprep.subr.mxu1 %v1767_v47  ;;  %v3407_v47 = vld [vmem:[#allocation15_spill] sm:$0xff] }
 0x729   :  { %799 = vmatpush1.msra.mxu1 %v1774_v48  ;;  %v3408_v48 = vld [vmem:[#allocation16_spill] sm:$0xff] }
 0x72a   :  { %800 = vmatprep.subr.mxu1 %v1781_v49  ;;  %v3409_v49 = vld [vmem:[#allocation17_spill] sm:$0xff] }
 0x72b   :  { %801 = vmatpush1.msra.mxu1 %v1788_v50  ;;  %v3410_v50 = vld [vmem:[#allocation18_spill] sm:$0xff] }
 0x72c   :  { %802 = vmatprep.subr.mxu1 %v1795_v51  ;;  %v3411_v51 = vld [vmem:[#allocation19_spill] sm:$0xff] }
 0x72d   :  { %803 = vmatpush1.msra.mxu1 %v1802_v52  ;;  %v3412_v52 = vld [vmem:[#allocation20_spill] sm:$0xff] }
 0x72e   :  { %804 = vmatprep.subr.mxu1 %v1809_v53  ;;  %v3413_v53 = vld [vmem:[#allocation21_spill] sm:$0xff] }
 0x72f   :  { %805 = vmatpush1.msra.mxu1 %v1816_v54  ;;  %v3414_v54 = vld [vmem:[#allocation22_spill] sm:$0xff] }
 0x730   :  { %806 = vmatprep.subr.mxu1 %v1823_v55  ;;  %v3415_v55 = vld [vmem:[#allocation23_spill] sm:$0xff] }
 0x731   :  { %807 = vmatpush1.msra.mxu1 %v1830_v56  ;;  %v3416_v56 = vld [vmem:[#allocation24_spill] sm:$0xff] }
 0x732   :  { %808 = vmatprep.subr.mxu1 %v1837_v57  ;;  %v3417_v57 = vld [vmem:[#allocation25_spill] sm:$0xff] }
 0x733   :  { %809 = vmatpush1.msra.mxu1 %v1844_v58  ;;  %v3418_v58 = vld [vmem:[#allocation26_spill] sm:$0xff] }
 0x734   :  { %810 = vmatprep.subr.mxu1 %v1851_v59  ;;  %v3419_v59 = vld [vmem:[#allocation29_spill] sm:$0xff] }
 0x735   :  { %811 = vmatpush1.msra.mxu1 %v1858_v60  ;;  %v3420_v60 = vld [vmem:[#allocation30_spill] sm:$0xff] }
 0x736   :  { %812 = vmatprep.subr.mxu1 %v1865_v61  ;;  %v3421_v61 = vld [vmem:[#allocation31_spill] sm:$0xff] }
 0x737   :  { %813 = vmatpush1.msra.mxu1 %v1872_v62  ;;  %v3422_v62 = vld [vmem:[#allocation32_spill] sm:$0xff] }
 0x738   :  { %814 = vmatprep.subr.mxu1 %v1879_v63  ;;  %v3423_v63 = vld [vmem:[#allocation33_spill] sm:$0xff] }
 0x739   :  { %815 = vmatpush1.msra.mxu1 %v1886_v0  ;;  %v3424_v0 = vld [vmem:[#allocation34_spill] sm:$0xff] }
 0x73a   :  { %816 = vmatprep.subr.mxu1 %v1893_v1  ;;  %v2509_v1 = vld [vmem:[%s3219_s3 + $0xf8] sm:$0xff] }
 0x73b   :  { %817 = vmatpush1.msra.mxu1 %v1900_v2  ;;  %v3425_v2 = vld [vmem:[#allocation5_spill] sm:$0xff] }
 0x73c   :  { %818 = vmatprep.subr.mxu1 %v1907_v3  ;;  %v3426_v3 = vld [vmem:[#allocation6_spill] sm:$0xff] }
 0x73d   :  { %819 = vmatpush1.msra.mxu1 %v1914_v5  ;;  %v158_v5 = vadd.f32 %v3426_v3, %v3425_v2  ;;  %v2567_v3 = vld [vmem:[%s3219_s3 + $0xd8] sm:$0xff] }
 0x73e   :  { %820 = vmatprep.subr.mxu1 %v1921_v6 }
 0x73f   :  { %821 = vmatpush1.msra.mxu1 %v1928_v7  ;;  %v3427_v7 = vld [vmem:[#allocation7_spill] sm:$0xff] }
 0x740   :  { %822 = vmatprep.subr.mxu1 %v1935_v8  ;;  %v160_v8 = vadd.f32 %v3427_v7, %v3364_v28  ;;  %v2585_v7 = vld [vmem:[%s3219_s3 + $0xc0] sm:$0xff] }
 0x741   :  { %823 = vmatpush1.msra.mxu1 %v1942_v9 }
 0x742   :  { %824 = vmatprep.subr.mxu1 %v1949_v10 }
 0x743   :  { %825 = vmatpush2.msra.mxu1 %v1956_v13 }
 0x744   :  { %826 = vmatprep.subr.mxu1 %v1963_v14 }
 0x745   :  { %827 = vmatpush2.msra.mxu1 %v1970_v15 }
 0x746   :  { %828 = vmatprep.subr.mxu1 %v1977_v16 }
 0x747   :  { %829 = vmatpush2.msra.mxu1 %v1984_v17 }
 0x748   :  { %830 = vmatprep.subr.mxu1 %v1991_v18 }
 0x749   :  { %831 = vmatpush2.msra.mxu1 %v1998_v19 }
 0x74a   :  { %832 = vmatprep.subr.mxu1 %v2005_v20 }
 0x74b   :  { %833 = vmatpush2.msra.mxu1 %v3402_v42 }
 0x74c   :  { %834 = vmatprep.subr.mxu1 %v3403_v43 }
 0x74d   :  { %835 = vmatpush2.msra.mxu1 %v3404_v44 }
 0x74e   :  { %836 = vmatprep.subr.mxu1 %v3405_v45 }
 0x74f   :  { %837 = vmatpush2.msra.mxu1 %v3406_v46 }
 0x750   :  { %838 = vmatprep.subr.mxu1 %v3407_v47 }
 0x751   :  { %839 = vmatpush2.msra.mxu1 %v3408_v48 }
 0x752   :  { %840 = vmatprep.subr.mxu1 %v3409_v49 }
 0x753   :  { %841 = vmatpush2.msra.mxu1 %v3410_v50 }
 0x754   :  { %842 = vmatprep.subr.mxu1 %v3411_v51  ;;  %v2549_v51 = vld [vmem:[%s3219_s3 + $0xf0] sm:$0xff] }
 0x755   :  { %843 = vmatpush2.msra.mxu1 %v3412_v52  ;;  %v2555_v52 = vld [vmem:[%s3219_s3 + $0xe8] sm:$0xff] }
 0x756   :  { %844 = vmatprep.subr.mxu1 %v3413_v53  ;;  %v2561_v53 = vld [vmem:[%s3219_s3 + $0xe0] sm:$0xff] }
 0x757   :  { %845 = vmatpush2.msra.mxu1 %v3414_v54 }
 0x758   :  { %846 = vmatprep.subr.mxu1 %v3415_v55 }
 0x759   :  { %847 = vmatpush2.msra.mxu1 %v3416_v56 }
 0x75a   :  { %848 = vmatprep.subr.mxu1 %v3417_v57 }
 0x75b   :  { %849 = vmatpush2.msra.mxu1 %v3418_v58 }
 0x75c   :  { %850 = vmatprep.subr.mxu1 %v3419_v59 }
 0x75d   :  { %851 = vmatpush2.msra.mxu1 %v3420_v60 }
 0x75e   :  { %852 = vmatprep.subr.mxu1 %v3421_v61 }
 0x75f   :  { %853 = vmatpush2.msra.mxu1 %v3422_v62 }
 0x760   :  { %854 = vmatprep.subr.mxu1 %v3423_v63 }
 0x761   :  { %855 = vmatpush2.msra.mxu1 %v3424_v0 }
 0x762   :  { %1026 = vmatprep.subr.mxu1 %v2509_v1 }
 0x7e2   :  { %v624_v6 = vpop.f32.mrf.mxu1 }
 0x7e3   :  { %v625_v9 = vadd.f32 %v624_v6, %v158_v5  ;;  %v2573_v5 = vld [vmem:[%s3219_s3 + $0xd0] sm:$0xff]  ;;  %v2579_v6 = vld [vmem:[%s3219_s3 + $0xc8] sm:$0xff] }
 0x7e4   :  { %v626_v10 = vpop.f32.mrf.mxu1 }
 0x7e5   :  { %v1381_v13 = vmul.f32 -1.442695, %v625_v9  ;;  %v627_v14 = vadd.f32 %v626_v10, %v160_v8  ;;  %v2591_v8 = vld [vmem:[%s3219_s3 + $0xb8] sm:$0xff]  ;;  %v2597_v9 = vld [vmem:[%s3219_s3 + $0xb0] sm:$0xff]  ;;  %v2603_v10 = vld [vmem:[%s3219_s3 + $0xa8] sm:$0xff] }
 0x7e7   :  { %1465 = vpow2.f32 %v1381_v13  ;;  %v1382_v15 = vmul.f32 -1.442695, %v627_v14  ;;  %v2609_v13 = vld [vmem:[%s3219_s3 + $0xa0] sm:$0xff]  ;;  %v2615_v14 = vld [vmem:[%s3219_s3 + $0x98] sm:$0xff] }
 0x7e9   :  { %1467 = vpow2.f32 %v1382_v15  ;;  %v2621_v15 = vld [vmem:[%s3219_s3 + $0x90] sm:$0xff] }
 0x7f4   :  { %v1466_v16 = vpop.eup %1465 }
 0x7f5   :  { %v635_v17 = vadd.f32 1.0, %v1466_v16  ;;  %v2627_v16 = vld [vmem:[%s3219_s3 + $0x88] sm:$0xff] }
 0x7f6   :  { %v1468_v18 = vpop.eup %1467 }
 0x7f7   :  { %1469 = vrcp.f32 %v635_v17  ;;  %v636_v19 = vadd.f32 1.0, %v1468_v18  ;;  %v2633_v17 = vld [vmem:[%s3219_s3 + $0x80] sm:$0xff]  ;;  %v2639_v18 = vld [vmem:[%s3219_s3 + $0x78] sm:$0xff] }
 0x7f9   :  { %1471 = vrcp.f32 %v636_v19  ;;  %v2645_v19 = vld [vmem:[%s3219_s3 + $0x70] sm:$0xff] }
 0x804   :  { %v1470_v20 = vpop.eup %1469 }
 0x805   :  { %v641_v30 = vmul.f32 2.0, %v1470_v20 }
 0x806   :  { %v1472_v24 = vpop.eup %1471 }
 0x807   :  { %v1383_v41 = vadd.f32 -1.0, %v641_v30  ;;  %v642_v39 = vmul.f32 2.0, %v1472_v24  ;;  %v2657_v30 = vld [vmem:[%s3219_s3 + $0x60] sm:$0xff] }
 0x809   :  { %v645_v27 = vsel %vm1698_vm3, %v1383_v41, %v1470_v20  ;;  %v1384_v40 = vadd.f32 -1.0, %v642_v39  ;;  %v2651_v20 = vld [vmem:[%s3219_s3 + $0x68] sm:$0xff]  ;;  %v2669_v41 = vld [vmem:[%s3219_s3 + $0x50] sm:$0xff] }
 0x80a   :  { %649 = vrot.lane.b32.xlu0 %v645_v27, %s1624_s2  ;;  %v647_v22 = vmul.f32 %v645_v27, %v2431_v29  ;;  %v2675_v39 = vld [vmem:[%s3219_s3 + $0x48] sm:$0xff] }
 0x80b   :  { %v646_v21 = vsel %vm1708_vm6, %v1384_v40, %v1472_v24  ;;  %v2663_v24 = vld [vmem:[%s3219_s3 + $0x58] sm:$0xff] }
 0x80c   :  { %651 = vrot.lane.b32.xlu1 %v646_v21, %s1624_s2  ;;  %v648_v26 = vmul.f32 %v646_v21, %v2433_v36  ;;  %v2687_v40 = vld [vmem:[%s3219_s3 + $0x38] sm:$0xff] }
 0x87c   :  { %v650_v11 = vpop.permute.xlu0 %649 }
 0x87e   :  { %v652_v32 = vpop.permute.xlu1 %651 }
 0x87f   :  { %v653_v35 = vsel %vm297_vm7, %v650_v11, %v652_v32  ;;  %v654_v34 = vsel %vm297_vm7, %v652_v32, %v650_v11  ;;  %v2699_v11 = vld [vmem:[%s3219_s3 + $0x28] sm:$0xff]  ;;  %v2705_v32 = vld [vmem:[%s3219_s3 + $0x20] sm:$0xff] }
 0x880   :  { %v655_v31 = vmul.f32 %v654_v34, %v645_v27  ;;  %v656_v37 = vmul.f32 %v653_v35, %v646_v21  ;;  %v2711_v35 = vld [vmem:[%s3219_s3 + $0x18] sm:$0xff]  ;;  %v2717_v34 = vld [vmem:[%s3219_s3 + $0x10] sm:$0xff] }
 0x882   :  { %657 = vrot.lane.b32.xlu0 %v655_v31, %s1625_s8  ;;  %659 = vrot.lane.b32.xlu1 %v656_v37, %s1625_s8  ;;  %v2723_v31 = vld [vmem:[%s3219_s3 + $0x8] sm:$0xff]  ;;  %v2729_v37 = vld [vmem:[%s3219_s3] sm:$0xff] }
 0x8f4   :  { %v658_v38 = vpop.permute.xlu0 %657  ;;  %v660_v4 = vpop.permute.xlu1 %659 }
 0x8f5   :  { %v661_v12 = vsel %vm255_vm2, %v658_v38, %v660_v4  ;;  %v662_v42 = vsel %vm255_vm2, %v660_v4, %v658_v38  ;;  %v2735_v38 = vld [vmem:[%s3219_s3 + $0x1f8] sm:$0xff]  ;;  %v2747_v4 = vld [vmem:[%s3219_s3 + $0x1e8] sm:$0xff] }
 0x8f6   :  { %v2534_v43 = vadd.f32 %v661_v12, %v647_v22  ;;  %v2536_v44 = vadd.f32 %v662_v42, %v648_v26  ;;  %v2741_v26 = vld [vmem:[%s3219_s3 + $0x1f0] sm:$0xff]  ;;  %v2753_v22 = vld [vmem:[%s3219_s3 + $0x1e0] sm:$0xff]  ;;  %v2759_v12 = vld [vmem:[%s3219_s3 + $0x1d8] sm:$0xff] }
 0x8f7   :  { %v2765_v42 = vld [vmem:[%s3219_s3 + $0x1d0] sm:$0xff] }
 0x8f8   :  { %1473 = vtanh.f32 %v2534_v43 }
 0x8f9   :  { %1475 = vtanh.f32 %v2536_v44 }
 0x905   :  { %v1474_v45 = vpop.eup %1473 }
 0x906   :  { %v1476_v46 = vpop.eup %1475  ;;  %667 = vrot.lane.b32.xlu0 %v1474_v45, %s1624_s2  ;;  %v2771_v45 = vld [vmem:[%s3219_s3 + $0x1c8] sm:$0xff] }
 0x907   :  { %669 = vrot.lane.b32.xlu1 %v1476_v46, %s1624_s2  ;;  %v2777_v46 = vld [vmem:[%s3219_s3 + $0x1c0] sm:$0xff] }
 0x978   :  { %v668_v29 = vpop.permute.xlu0 %667 }
 0x979   :  { %v670_v36 = vpop.permute.xlu1 %669 }
 0x97a   :  { %v671_v47 = vsel %vm297_vm7, %v668_v29, %v670_v36  ;;  %v672_v48 = vsel %vm297_vm7, %v670_v36, %v668_v29  ;;  %v2783_v29 = vld [vmem:[%s3219_s3 + $0x1b8] sm:$0xff]  ;;  %v2789_v36 = vld [vmem:[%s3219_s3 + $0x1b0] sm:$0xff] }
 0x97b   :  { %v673_v49 = vmul.f32 %v672_v48, %v645_v27  ;;  %v674_v50 = vmul.f32 %v671_v47, %v646_v21  ;;  %v2681_v27 = vld [vmem:[%s3219_s3 + $0x40] sm:$0xff]  ;;  %v2693_v21 = vld [vmem:[%s3219_s3 + $0x30] sm:$0xff]  ;;  %3428 = vst [vmem:[#allocation10_spill] sm:$0xff] %v2789_v36  ;;  %v2795_v47 = vld [vmem:[%s3219_s3 + $0x1a8] sm:$0xff] }
 0x97c   :  { %3429 = vst [vmem:[#allocation11_spill] sm:$0xff] %v2795_v47  ;;  %v2801_v48 = vld [vmem:[%s3219_s3 + $0x1a0] sm:$0xff] }
 0x97d   :  { %739 = vmatprep.mubr.f32.mxu0 %v674_v50  ;;  %3430 = vst [vmem:[#allocation12_spill] sm:$0xff] %v2801_v48  ;;  %v2813_v50 = vld [vmem:[%s3219_s3 + $0x190] sm:$0xff] }
 0x97e   :  { %740 = vmatmul.mubr.f32.vlgmr.msra.gmra.mxu0 %v673_v49  ;;  %v2807_v49 = vld [vmem:[%s3219_s3 + $0x198] sm:$0xff]  ;;  %3432 = vst [vmem:[#allocation14_spill] sm:$0xff] %v2813_v50 }
 0x97f   :  { %910 = vmatpush1.msra.mxu0 %v2549_v51  ;;  %3431 = vst [vmem:[#allocation13_spill] sm:$0xff] %v2807_v49 }
 0x980   :  { %911 = vmatprep.subr.mxu0 %v2555_v52 }
 0x981   :  { %912 = vmatpush1.msra.mxu0 %v2561_v53 }
 0x982   :  { %913 = vmatprep.subr.mxu0 %v2567_v3 }
 0x983   :  { %914 = vmatpush1.msra.mxu0 %v2573_v5 }
 0x984   :  { %915 = vmatprep.subr.mxu0 %v2579_v6 }
 0x985   :  { %916 = vmatpush1.msra.mxu0 %v2585_v7 }
 0x986   :  { %917 = vmatprep.subr.mxu0 %v2591_v8 }
 0x987   :  { %918 = vmatpush1.msra.mxu0 %v2597_v9 }
 0x988   :  { %919 = vmatprep.subr.mxu0 %v2603_v10 }
 0x989   :  { %920 = vmatpush1.msra.mxu0 %v2609_v13 }
 0x98a   :  { %921 = vmatprep.subr.mxu0 %v2615_v14 }
 0x98b   :  { %922 = vmatpush1.msra.mxu0 %v2621_v15 }
 0x98c   :  { %923 = vmatprep.subr.mxu0 %v2627_v16 }
 0x98d   :  { %924 = vmatpush1.msra.mxu0 %v2633_v17 }
 0x98e   :  { %925 = vmatprep.subr.mxu0 %v2639_v18 }
 0x98f   :  { %926 = vmatpush1.msra.mxu0 %v2645_v19 }
 0x990   :  { %927 = vmatprep.subr.mxu0 %v2651_v20 }
 0x991   :  { %928 = vmatpush1.msra.mxu0 %v2657_v30 }
 0x992   :  { %929 = vmatprep.subr.mxu0 %v2663_v24 }
 0x993   :  { %930 = vmatpush1.msra.mxu0 %v2669_v41 }
 0x994   :  { %931 = vmatprep.subr.mxu0 %v2675_v39 }
 0x995   :  { %932 = vmatpush1.msra.mxu0 %v2681_v27 }
 0x996   :  { %933 = vmatprep.subr.mxu0 %v2687_v40 }
 0x997   :  { %934 = vmatpush1.msra.mxu0 %v2693_v21 }
 0x998   :  { %935 = vmatprep.subr.mxu0 %v2699_v11 }
 0x999   :  { %936 = vmatpush1.msra.mxu0 %v2705_v32 }
 0x99a   :  { %937 = vmatprep.subr.mxu0 %v2711_v35 }
 0x99b   :  { %938 = vmatpush1.msra.mxu0 %v2717_v34 }
 0x99c   :  { %939 = vmatprep.subr.mxu0 %v2723_v31 }
 0x99d   :  { %940 = vmatpush1.msra.mxu0 %v2729_v37 }
 0x99e   :  { %941 = vmatprep.subr.mxu0 %v2735_v38 }
 0x99f   :  { %942 = vmatpush2.msra.mxu0 %v2741_v26 }
 0x9a0   :  { %943 = vmatprep.subr.mxu0 %v2747_v4 }
 0x9a1   :  { %944 = vmatpush2.msra.mxu0 %v2753_v22 }
 0x9a2   :  { %945 = vmatprep.subr.mxu0 %v2759_v12 }
 0x9a3   :  { %946 = vmatpush2.msra.mxu0 %v2765_v42 }
 0x9a4   :  { %947 = vmatprep.subr.mxu0 %v2771_v45 }
 0x9a5   :  { %948 = vmatpush2.msra.mxu0 %v2777_v46 }
 0x9a6   :  { %949 = vmatprep.subr.mxu0 %v2783_v29 }
 0x9a7   :  { %950 = vmatpush2.msra.mxu0 %v2789_v36 }
 0x9a8   :  { %951 = vmatprep.subr.mxu0 %v2795_v47  ;;  %v2819_v47 = vld [vmem:[%s3219_s3 + $0x188] sm:$0xff] }
 0x9a9   :  { %952 = vmatpush2.msra.mxu0 %v2801_v48  ;;  %3433 = vst [vmem:[#allocation15_spill] sm:$0xff] %v2819_v47  ;;  %v2825_v48 = vld [vmem:[%s3219_s3 + $0x180] sm:$0xff] }
 0x9aa   :  { %953 = vmatprep.subr.mxu0 %v2807_v49  ;;  %3434 = vst [vmem:[#allocation16_spill] sm:$0xff] %v2825_v48  ;;  %v2831_v49 = vld [vmem:[%s3219_s3 + $0x178] sm:$0xff] }
 0x9ab   :  { %954 = vmatpush2.msra.mxu0 %v2813_v50  ;;  %3435 = vst [vmem:[#allocation17_spill] sm:$0xff] %v2831_v49  ;;  %v2837_v50 = vld [vmem:[%s3219_s3 + $0x170] sm:$0xff] }
 0x9ac   :  { %955 = vmatprep.subr.mxu0 %v2819_v47  ;;  %3436 = vst [vmem:[#allocation18_spill] sm:$0xff] %v2837_v50  ;;  %v2843_v47 = vld [vmem:[%s3219_s3 + $0x168] sm:$0xff] }
 0x9ad   :  { %956 = vmatpush2.msra.mxu0 %v2825_v48  ;;  %3437 = vst [vmem:[#allocation19_spill] sm:$0xff] %v2843_v47  ;;  %v2849_v48 = vld [vmem:[%s3219_s3 + $0x160] sm:$0xff] }
 0x9ae   :  { %957 = vmatprep.subr.mxu0 %v2831_v49  ;;  %3438 = vst [vmem:[#allocation20_spill] sm:$0xff] %v2849_v48  ;;  %v2855_v49 = vld [vmem:[%s3219_s3 + $0x158] sm:$0xff] }
 0x9af   :  { %958 = vmatpush2.msra.mxu0 %v2837_v50  ;;  %3439 = vst [vmem:[#allocation21_spill] sm:$0xff] %v2855_v49 }
 0x9b0   :  { %959 = vmatprep.subr.mxu0 %v2843_v47 }
 0x9b1   :  { %960 = vmatpush2.msra.mxu0 %v2849_v48 }
 0x9b2   :  { %961 = vmatprep.subr.mxu0 %v2855_v49 }
 0x9b3   :  { %962 = vmatpush2.msra.mxu0 %v3414_v54  ;;  %v3440_v54 = vld [vmem:[#allocation8_spill] sm:$0xff] }
 0x9b4   :  { %963 = vmatprep.subr.mxu0 %v3415_v55  ;;  %v164_v55 = vadd.f32 %v3440_v54, %v3425_v2 }
 0x9b5   :  { %964 = vmatpush2.msra.mxu0 %v3416_v56 }
 0x9b6   :  { %965 = vmatprep.subr.mxu0 %v3417_v57  ;;  %v3441_v57 = vld [vmem:[#allocation28_spill] sm:$0xff] }
 0x9b7   :  { %966 = vmatpush2.msra.mxu0 %v3418_v58  ;;  %v166_v58 = vadd.f32 %v3441_v57, %v3364_v28 }
 0x9b8   :  { %967 = vmatprep.subr.mxu0 %v3419_v59 }
 0x9b9   :  { %968 = vmatpush2.msra.mxu0 %v3420_v60 }
 0x9ba   :  { %969 = vmatprep.subr.mxu0 %v3421_v61 }
 0x9bb   :  { %970 = vmatpush2.msra.mxu0 %v3422_v62 }
 0x9bc   :  { %971 = vmatprep.subr.mxu0 %v3423_v63 }
 0x9bd   :  { %972 = vmatpush2.msra.mxu0 %v3424_v0 }
 0x9be   :  { %1143 = vmatprep.subr.mxu0 %v2509_v1 }
 0xa3e   :  { %v741_v56 = vpop.f32.mrf.mxu0 }
 0xa3f   :  { %v742_v59 = vadd.f32 %v741_v56, %v164_v55 }
 0xa40   :  { %v743_v49 = vpop.f32.mrf.mxu0 }
 0xa41   :  { %v1385_v60 = vmul.f32 -1.442695, %v742_v59  ;;  %v744_v48 = vadd.f32 %v743_v49, %v166_v58 }
 0xa43   :  { %1477 = vpow2.f32 %v1385_v60  ;;  %v1386_v61 = vmul.f32 -1.442695, %v744_v48 }
 0xa45   :  { %1479 = vpow2.f32 %v1386_v61 }
 0xa50   :  { %v1478_v62 = vpop.eup %1477 }
 0xa51   :  { %v752_v63 = vadd.f32 1.0, %v1478_v62 }
 0xa52   :  { %v1480_v47 = vpop.eup %1479 }
 0xa53   :  { %1481 = vrcp.f32 %v752_v63  ;;  %v753_v0 = vadd.f32 1.0, %v1480_v47 }
 0xa55   :  { %1483 = vrcp.f32 %v753_v0 }
 0xa60   :  { %v1482_v1 = vpop.eup %1481 }
 0xa61   :  { %v758_v50 = vmul.f32 2.0, %v1482_v1 }
 0xa62   :  { %v1484_v54 = vpop.eup %1483 }
 0xa63   :  { %v1387_v2 = vadd.f32 -1.0, %v758_v50  ;;  %v759_v36 = vmul.f32 2.0, %v1484_v54 }
 0xa65   :  { %v762_v55 = vsel %vm1698_vm3, %v1387_v2, %v1482_v1  ;;  %v1388_v56 = vadd.f32 -1.0, %v759_v36 }
 0xa66   :  { %766 = vrot.lane.b32.xlu0 %v762_v55, %s1624_s2  ;;  %v764_v61 = vmul.f32 %v762_v55, %v2534_v43 }
 0xa67   :  { %v763_v48 = vsel %vm1708_vm6, %v1388_v56, %v1484_v54 }
 0xa68   :  { %768 = vrot.lane.b32.xlu1 %v763_v48, %s1624_s2  ;;  %v765_v36 = vmul.f32 %v763_v48, %v2536_v44 }
 0xad8   :  { %v767_v49 = vpop.permute.xlu0 %766 }
 0xada   :  { %v769_v57 = vpop.permute.xlu1 %768 }
 0xadb   :  { %v770_v47 = vsel %vm297_vm7, %v767_v49, %v769_v57  ;;  %v771_v50 = vsel %vm297_vm7, %v769_v57, %v767_v49 }
 0xadc   :  { %v772_v58 = vmul.f32 %v771_v50, %v762_v55  ;;  %v773_v59 = vmul.f32 %v770_v47, %v763_v48 }
 0xade   :  { %774 = vrot.lane.b32.xlu0 %v772_v58, %s1625_s8  ;;  %776 = vrot.lane.b32.xlu1 %v773_v59, %s1625_s8  ;;  %v3444_v58 = vld [vmem:[#allocation12_spill] sm:$0xff]  ;;  %v3445_v59 = vld [vmem:[#allocation13_spill] sm:$0xff] }
 0xb50   :  { %v775_v2 = vpop.permute.xlu0 %774  ;;  %v777_v60 = vpop.permute.xlu1 %776 }
 0xb51   :  { %v778_v62 = vsel %vm255_vm2, %v775_v2, %v777_v60  ;;  %v779_v63 = vsel %vm255_vm2, %v777_v60, %v775_v2  ;;  %v3446_v2 = vld [vmem:[#allocation14_spill] sm:$0xff]  ;;  %v3448_v60 = vld [vmem:[#allocation16_spill] sm:$0xff] }
 0xb52   :  { %v2892_v0 = vadd.f32 %v778_v62, %v764_v61  ;;  %v2894_v1 = vadd.f32 %v779_v63, %v765_v36  ;;  %v3447_v36 = vld [vmem:[#allocation15_spill] sm:$0xff]  ;;  %v3449_v61 = vld [vmem:[#allocation17_spill] sm:$0xff]  ;;  %v3450_v62 = vld [vmem:[#allocation18_spill] sm:$0xff] }
 0xb53   :  { %v3451_v63 = vld [vmem:[#allocation19_spill] sm:$0xff] }
 0xb54   :  { %1485 = vtanh.f32 %v2892_v0 }
 0xb55   :  { %1487 = vtanh.f32 %v2894_v1 }
 0xb61   :  { %v1486_v54 = vpop.eup %1485 }
 0xb62   :  { %v1488_v56 = vpop.eup %1487  ;;  %784 = vrot.lane.b32.xlu0 %v1486_v54, %s1624_s2  ;;  %v3452_v54 = vld [vmem:[#allocation20_spill] sm:$0xff] }
 0xb63   :  { %786 = vrot.lane.b32.xlu1 %v1488_v56, %s1624_s2  ;;  %v3453_v56 = vld [vmem:[#allocation21_spill] sm:$0xff] }
 0xbd4   :  { %v785_v43 = vpop.permute.xlu0 %784 }
 0xbd5   :  { %v787_v44 = vpop.permute.xlu1 %786 }
 0xbd6   :  { %v788_v49 = vsel %vm297_vm7, %v785_v43, %v787_v44  ;;  %v789_v57 = vsel %vm297_vm7, %v787_v44, %v785_v43  ;;  %v2959_v43 = vld [vmem:[%s3219_s3 + $0x150] sm:$0xff]  ;;  %v2965_v44 = vld [vmem:[%s3219_s3 + $0x148] sm:$0xff] }
 0xbd7   :  { %v790_v47 = vmul.f32 %v789_v57, %v762_v55  ;;  %v791_v50 = vmul.f32 %v788_v49, %v763_v48  ;;  %v3442_v55 = vld [vmem:[#allocation10_spill] sm:$0xff]  ;;  %v3443_v48 = vld [vmem:[#allocation11_spill] sm:$0xff]  ;;  %3454 = vst [vmem:[#allocation22_spill] sm:$0xff] %v2959_v43  ;;  %3455 = vst [vmem:[#allocation23_spill] sm:$0xff] %v2965_v44 }
 0xbd8   :  { %v2971_v49 = vld [vmem:[%s3219_s3 + $0x140] sm:$0xff]  ;;  %v2977_v57 = vld [vmem:[%s3219_s3 + $0x138] sm:$0xff] }
 0xbd9   :  { %856 = vmatprep.mubr.f32.mxu1 %v791_v50  ;;  %3456 = vst [vmem:[#allocation24_spill] sm:$0xff] %v2971_v49  ;;  %3457 = vst [vmem:[#allocation25_spill] sm:$0xff] %v2977_v57  ;;  %v2989_v50 = vld [vmem:[%s3219_s3 + $0x128] sm:$0xff] }
 0xbda   :  { %857 = vmatmul.mubr.f32.vlgmr.msra.gmra.mxu1 %v790_v47  ;;  %v2983_v47 = vld [vmem:[%s3219_s3 + $0x130] sm:$0xff]  ;;  %3459 = vst [vmem:[#allocation29_spill] sm:$0xff] %v2989_v50 }
 0xbdb   :  { %1027 = vmatpush1.msra.mxu1 %v2549_v51  ;;  %3458 = vst [vmem:[#allocation26_spill] sm:$0xff] %v2983_v47 }
 0xbdc   :  { %1028 = vmatprep.subr.mxu1 %v2555_v52 }
 0xbdd   :  { %1029 = vmatpush1.msra.mxu1 %v2561_v53 }
 0xbde   :  { %1030 = vmatprep.subr.mxu1 %v2567_v3 }
 0xbdf   :  { %1031 = vmatpush1.msra.mxu1 %v2573_v5 }
 0xbe0   :  { %1032 = vmatprep.subr.mxu1 %v2579_v6 }
 0xbe1   :  { %1033 = vmatpush1.msra.mxu1 %v2585_v7 }
 0xbe2   :  { %1034 = vmatprep.subr.mxu1 %v2591_v8 }
 0xbe3   :  { %1035 = vmatpush1.msra.mxu1 %v2597_v9 }
 0xbe4   :  { %1036 = vmatprep.subr.mxu1 %v2603_v10 }
 0xbe5   :  { %1037 = vmatpush1.msra.mxu1 %v2609_v13 }
 0xbe6   :  { %1038 = vmatprep.subr.mxu1 %v2615_v14 }
 0xbe7   :  { %1039 = vmatpush1.msra.mxu1 %v2621_v15 }
 0xbe8   :  { %1040 = vmatprep.subr.mxu1 %v2627_v16 }
 0xbe9   :  { %1041 = vmatpush1.msra.mxu1 %v2633_v17 }
 0xbea   :  { %1042 = vmatprep.subr.mxu1 %v2639_v18 }
 0xbeb   :  { %1043 = vmatpush1.msra.mxu1 %v2645_v19 }
 0xbec   :  { %1044 = vmatprep.subr.mxu1 %v2651_v20 }
 0xbed   :  { %1045 = vmatpush1.msra.mxu1 %v2657_v30 }
 0xbee   :  { %1046 = vmatprep.subr.mxu1 %v2663_v24 }
 0xbef   :  { %1047 = vmatpush1.msra.mxu1 %v2669_v41 }
 0xbf0   :  { %1048 = vmatprep.subr.mxu1 %v2675_v39 }
 0xbf1   :  { %1049 = vmatpush1.msra.mxu1 %v2681_v27 }
 0xbf2   :  { %1050 = vmatprep.subr.mxu1 %v2687_v40 }
 0xbf3   :  { %1051 = vmatpush1.msra.mxu1 %v2693_v21 }
 0xbf4   :  { %1052 = vmatprep.subr.mxu1 %v2699_v11 }
 0xbf5   :  { %1053 = vmatpush1.msra.mxu1 %v2705_v32 }
 0xbf6   :  { %1054 = vmatprep.subr.mxu1 %v2711_v35 }
 0xbf7   :  { %1055 = vmatpush1.msra.mxu1 %v2717_v34 }
 0xbf8   :  { %1056 = vmatprep.subr.mxu1 %v2723_v31 }
 0xbf9   :  { %1057 = vmatpush1.msra.mxu1 %v2729_v37 }
 0xbfa   :  { %1058 = vmatprep.subr.mxu1 %v2735_v38 }
 0xbfb   :  { %1059 = vmatpush2.msra.mxu1 %v2741_v26 }
 0xbfc   :  { %1060 = vmatprep.subr.mxu1 %v2747_v4 }
 0xbfd   :  { %1061 = vmatpush2.msra.mxu1 %v2753_v22 }
 0xbfe   :  { %1062 = vmatprep.subr.mxu1 %v2759_v12 }
 0xbff   :  { %1063 = vmatpush2.msra.mxu1 %v2765_v42 }
 0xc00   :  { %1064 = vmatprep.subr.mxu1 %v2771_v45 }
 0xc01   :  { %1065 = vmatpush2.msra.mxu1 %v2777_v46 }
 0xc02   :  { %1066 = vmatprep.subr.mxu1 %v2783_v29 }
 0xc03   :  { %1067 = vmatpush2.msra.mxu1 %v3442_v55 }
 0xc04   :  { %1068 = vmatprep.subr.mxu1 %v3443_v48 }
 0xc05   :  { %1069 = vmatpush2.msra.mxu1 %v3444_v58 }
 0xc06   :  { %1070 = vmatprep.subr.mxu1 %v3445_v59 }
 0xc07   :  { %1071 = vmatpush2.msra.mxu1 %v3446_v2 }
 0xc08   :  { %1072 = vmatprep.subr.mxu1 %v3447_v36 }
 0xc09   :  { %1073 = vmatpush2.msra.mxu1 %v3448_v60 }
 0xc0a   :  { %1074 = vmatprep.subr.mxu1 %v3449_v61 }
 0xc0b   :  { %1075 = vmatpush2.msra.mxu1 %v3450_v62 }
 0xc0c   :  { %1076 = vmatprep.subr.mxu1 %v3451_v63 }
 0xc0d   :  { %1077 = vmatpush2.msra.mxu1 %v3452_v54  ;;  %v3468_v54 = vld [vmem:[#allocation9_spill] sm:$0xff] }
 0xc0e   :  { %1078 = vmatprep.subr.mxu1 %v3453_v56  ;;  %v172_v63 = vadd.f32 %v3468_v54, %v3364_v28 }
 0xc0f   :  { %1079 = vmatpush2.msra.mxu1 %v2959_v43  ;;  %v3467_v43 = vld [vmem:[#allocation27_spill] sm:$0xff] }
 0xc10   :  { %1080 = vmatprep.subr.mxu1 %v2965_v44  ;;  %v3466_v44 = vld [vmem:[#allocation5_spill] sm:$0xff] }
 0xc11   :  { %1081 = vmatpush2.msra.mxu1 %v2971_v49  ;;  %v2995_v49 = vld [vmem:[%s3219_s3 + $0x120] sm:$0xff]  ;;  %v170_v56 = vadd.f32 %v3467_v43, %v3466_v44 }
 0xc12   :  { %1082 = vmatprep.subr.mxu1 %v2977_v57  ;;  %3460 = vst [vmem:[#allocation30_spill] sm:$0xff] %v2995_v49  ;;  %v3001_v57 = vld [vmem:[%s3219_s3 + $0x118] sm:$0xff] }
 0xc13   :  { %1083 = vmatpush2.msra.mxu1 %v2983_v47  ;;  %3461 = vst [vmem:[#allocation31_spill] sm:$0xff] %v3001_v57  ;;  %v3007_v47 = vld [vmem:[%s3219_s3 + $0x110] sm:$0xff] }
 0xc14   :  { %1084 = vmatprep.subr.mxu1 %v2989_v50  ;;  %3462 = vst [vmem:[#allocation32_spill] sm:$0xff] %v3007_v47  ;;  %v3013_v50 = vld [vmem:[%s3219_s3 + $0x108] sm:$0xff] }
 0xc15   :  { %1085 = vmatpush2.msra.mxu1 %v2995_v49  ;;  %3463 = vst [vmem:[#allocation33_spill] sm:$0xff] %v3013_v50  ;;  %v3019_v49 = vld [vmem:[%s3219_s3 + $0x100] sm:$0xff] }
 0xc16   :  { %1086 = vmatprep.subr.mxu1 %v3001_v57  ;;  %3464 = vst [vmem:[#allocation34_spill] sm:$0xff] %v3019_v49  ;;  %v3465_v57 = vmov 0.0  }
 0xc17   :  { %1087 = vmatpush2.msra.mxu1 %v3007_v47 }
 0xc18   :  { %1088 = vmatprep.subr.mxu1 %v3013_v50 }
 0xc19   :  { %1089 = vmatpush2.msra.mxu1 %v3019_v49 }
 0xc1a   :  { %1412 = vmatprep.subr.mxu1 %v3465_v57 }
 0xc9a   :  { %v858_v47 = vpop.f32.mrf.mxu1 }
 0xc9b   :  { %v859_v62 = vadd.f32 %v858_v47, %v170_v56 }
 0xc9c   :  { %v860_v61 = vpop.f32.mrf.mxu1 }
 0xc9d   :  { %v1389_v60 = vmul.f32 -1.442695, %v859_v62  ;;  %v861_v50 = vadd.f32 %v860_v61, %v172_v63 }
 0xc9f   :  { %1489 = vpow2.f32 %v1389_v60  ;;  %v1390_v36 = vmul.f32 -1.442695, %v861_v50 }
 0xca1   :  { %1491 = vpow2.f32 %v1390_v36 }
 0xcac   :  { %v1490_v2 = vpop.eup %1489 }
 0xcad   :  { %v869_v59 = vadd.f32 1.0, %v1490_v2 }
 0xcae   :  { %v1492_v58 = vpop.eup %1491 }
 0xcaf   :  { %1493 = vrcp.f32 %v869_v59  ;;  %v870_v49 = vadd.f32 1.0, %v1492_v58 }
 0xcb1   :  { %1495 = vrcp.f32 %v870_v49 }
 0xcbc   :  { %v1494_v57 = vpop.eup %1493 }
 0xcbd   :  { %v875_v48 = vmul.f32 2.0, %v1494_v57 }
 0xcbe   :  { %v1496_v43 = vpop.eup %1495 }
 0xcbf   :  { %v1391_v44 = vadd.f32 -1.0, %v875_v48  ;;  %v876_v55 = vmul.f32 2.0, %v1496_v43 }
 0xcc1   :  { %v879_v54 = vsel %vm1698_vm3, %v1391_v44, %v1494_v57  ;;  %v1392_v56 = vadd.f32 -1.0, %v876_v55 }
 0xcc2   :  { %883 = vrot.lane.b32.xlu0 %v879_v54, %s1624_s2  ;;  %v881_v44 = vmul.f32 %v879_v54, %v2892_v0 }
 0xcc3   :  { %v880_v36 = vsel %vm1708_vm6, %v1392_v56, %v1496_v43 }
 0xcc4   :  { %885 = vrot.lane.b32.xlu1 %v880_v36, %s1624_s2  ;;  %v882_v62 = vmul.f32 %v880_v36, %v2894_v1 }
 0xd34   :  { %v884_v2 = vpop.permute.xlu0 %883 }
 0xd36   :  { %v886_v59 = vpop.permute.xlu1 %885 }
 0xd37   :  { %v887_v58 = vsel %vm297_vm7, %v884_v2, %v886_v59  ;;  %v888_v48 = vsel %vm297_vm7, %v886_v59, %v884_v2 }
 0xd38   :  { %v889_v60 = vmul.f32 %v888_v48, %v879_v54  ;;  %v890_v61 = vmul.f32 %v887_v58, %v880_v36 }
 0xd3a   :  { %891 = vrot.lane.b32.xlu0 %v889_v60, %s1625_s8  ;;  %893 = vrot.lane.b32.xlu1 %v890_v61, %s1625_s8 }
 0xdac   :  { %v892_v55 = vpop.permute.xlu0 %891  ;;  %v894_v63 = vpop.permute.xlu1 %893 }
 0xdad   :  { %v895_v49 = vsel %vm255_vm2, %v892_v55, %v894_v63  ;;  %v896_v57 = vsel %vm255_vm2, %v894_v63, %v892_v55 }
 0xdae   :  { %v3045_v47 = vadd.f32 %v895_v49, %v881_v44  ;;  %v3047_v50 = vadd.f32 %v896_v57, %v882_v62 }
 0xdb0   :  { %1497 = vtanh.f32 %v3045_v47 }
 0xdb1   :  { %1499 = vtanh.f32 %v3047_v50 }
 0xdbd   :  { %v1498_v43 = vpop.eup %1497 }
 0xdbe   :  { %v1500_v56 = vpop.eup %1499  ;;  %901 = vrot.lane.b32.xlu0 %v1498_v43, %s1624_s2 }
 0xdbf   :  { %903 = vrot.lane.b32.xlu1 %v1500_v56, %s1624_s2 }
 0xe30   :  { %v902_v0 = vpop.permute.xlu0 %901 }
 0xe31   :  { %v904_v1 = vpop.permute.xlu1 %903 }
 0xe32   :  { %v905_v2 = vsel %vm297_vm7, %v902_v0, %v904_v1  ;;  %v906_v59 = vsel %vm297_vm7, %v904_v1, %v902_v0 }
 0xe33   :  { %v907_v58 = vmul.f32 %v906_v59, %v879_v54  ;;  %v908_v48 = vmul.f32 %v905_v2, %v880_v36 }
 0xe35   :  { %973 = vmatprep.mubr.f32.mxu0 %v908_v48 }
 0xe36   :  { %974 = vmatmul.mubr.f32.vlgmr.msra.gmra.mxu0 %v907_v58 }
 0xe37   :  { %1144 = vmatpush1.msra.mxu0 %v2549_v51  ;;  %v3469_v51 = vld [vmem:[#allocation10_spill] sm:$0xff] }
 0xe38   :  { %1145 = vmatprep.subr.mxu0 %v2555_v52  ;;  %v3470_v52 = vld [vmem:[#allocation11_spill] sm:$0xff] }
 0xe39   :  { %1146 = vmatpush1.msra.mxu0 %v2561_v53  ;;  %v3471_v53 = vld [vmem:[#allocation12_spill] sm:$0xff] }
 0xe3a   :  { %1147 = vmatprep.subr.mxu0 %v2567_v3  ;;  %v3472_v3 = vld [vmem:[#allocation13_spill] sm:$0xff] }
 0xe3b   :  { %1148 = vmatpush1.msra.mxu0 %v2573_v5  ;;  %v3473_v5 = vld [vmem:[#allocation14_spill] sm:$0xff] }
 0xe3c   :  { %1149 = vmatprep.subr.mxu0 %v2579_v6  ;;  %v3474_v6 = vld [vmem:[#allocation15_spill] sm:$0xff] }
 0xe3d   :  { %1150 = vmatpush1.msra.mxu0 %v2585_v7  ;;  %v3475_v7 = vld [vmem:[#allocation16_spill] sm:$0xff] }
 0xe3e   :  { %1151 = vmatprep.subr.mxu0 %v2591_v8  ;;  %v3476_v8 = vld [vmem:[#allocation17_spill] sm:$0xff] }
 0xe3f   :  { %1152 = vmatpush1.msra.mxu0 %v2597_v9  ;;  %v3477_v9 = vld [vmem:[#allocation18_spill] sm:$0xff] }
 0xe40   :  { %1153 = vmatprep.subr.mxu0 %v2603_v10  ;;  %v3478_v10 = vld [vmem:[#allocation19_spill] sm:$0xff] }
 0xe41   :  { %1154 = vmatpush1.msra.mxu0 %v2609_v13  ;;  %v3479_v13 = vld [vmem:[#allocation20_spill] sm:$0xff] }
 0xe42   :  { %1155 = vmatprep.subr.mxu0 %v2615_v14  ;;  %v3480_v14 = vld [vmem:[#allocation21_spill] sm:$0xff] }
 0xe43   :  { %1156 = vmatpush1.msra.mxu0 %v2621_v15  ;;  %v3481_v15 = vld [vmem:[#allocation22_spill] sm:$0xff] }
 0xe44   :  { %1157 = vmatprep.subr.mxu0 %v2627_v16  ;;  %v3482_v16 = vld [vmem:[#allocation23_spill] sm:$0xff] }
 0xe45   :  { %1158 = vmatpush1.msra.mxu0 %v2633_v17  ;;  %v3483_v17 = vld [vmem:[#allocation24_spill] sm:$0xff] }
 0xe46   :  { %1159 = vmatprep.subr.mxu0 %v2639_v18  ;;  %v3484_v18 = vld [vmem:[#allocation25_spill] sm:$0xff] }
 0xe47   :  { %1160 = vmatpush1.msra.mxu0 %v2645_v19  ;;  %v3485_v19 = vld [vmem:[#allocation26_spill] sm:$0xff] }
 0xe48   :  { %1161 = vmatprep.subr.mxu0 %v2651_v20  ;;  %v3486_v20 = vld [vmem:[#allocation29_spill] sm:$0xff] }
 0xe49   :  { %1162 = vmatpush1.msra.mxu0 %v2657_v30  ;;  %v3487_v30 = vld [vmem:[#allocation30_spill] sm:$0xff] }
 0xe4a   :  { %1163 = vmatprep.subr.mxu0 %v2663_v24  ;;  %v3488_v24 = vld [vmem:[#allocation31_spill] sm:$0xff] }
 0xe4b   :  { %1164 = vmatpush1.msra.mxu0 %v2669_v41  ;;  %v3489_v41 = vld [vmem:[#allocation32_spill] sm:$0xff] }
 0xe4c   :  { %1165 = vmatprep.subr.mxu0 %v2675_v39  ;;  %v3490_v39 = vld [vmem:[#allocation33_spill] sm:$0xff] }
 0xe4d   :  { %1166 = vmatpush1.msra.mxu0 %v2681_v27  ;;  %v3491_v27 = vld [vmem:[#allocation34_spill] sm:$0xff] }
 0xe4e   :  { %1167 = vmatprep.subr.mxu0 %v2687_v40  ;;  %v3492_v40 = vld [vmem:[#allocation5_spill] sm:$0xff] }
 0xe4f   :  { %1168 = vmatpush1.msra.mxu0 %v2693_v21  ;;  %v3493_v21 = vld [vmem:[#allocation35_spill] sm:$0xff] }
 0xe50   :  { %1169 = vmatprep.subr.mxu0 %v2699_v11  ;;  %v176_v11 = vadd.f32 %v3493_v21, %v3492_v40 }
 0xe51   :  { %1170 = vmatpush1.msra.mxu0 %v2705_v32 }
 0xe52   :  { %1171 = vmatprep.subr.mxu0 %v2711_v35  ;;  %v3494_v35 = vld [vmem:[#allocation36_spill] sm:$0xff] }
 0xe53   :  { %1172 = vmatpush1.msra.mxu0 %v2717_v34  ;;  %v178_v34 = vadd.f32 %v3494_v35, %v3364_v28 }
 0xe54   :  { %1173 = vmatprep.subr.mxu0 %v2723_v31 }
 0xe55   :  { %1174 = vmatpush1.msra.mxu0 %v2729_v37 }
 0xe56   :  { %1175 = vmatprep.subr.mxu0 %v2735_v38 }
 0xe57   :  { %1176 = vmatpush2.msra.mxu0 %v2741_v26 }
 0xe58   :  { %1177 = vmatprep.subr.mxu0 %v2747_v4 }
 0xe59   :  { %1178 = vmatpush2.msra.mxu0 %v2753_v22 }
 0xe5a   :  { %1179 = vmatprep.subr.mxu0 %v2759_v12 }
 0xe5b   :  { %1180 = vmatpush2.msra.mxu0 %v2765_v42 }
 0xe5c   :  { %1181 = vmatprep.subr.mxu0 %v2771_v45 }
 0xe5d   :  { %1182 = vmatpush2.msra.mxu0 %v2777_v46 }
 0xe5e   :  { %1183 = vmatprep.subr.mxu0 %v2783_v29 }
 0xe5f   :  { %1184 = vmatpush2.msra.mxu0 %v3469_v51 }
 0xe60   :  { %1185 = vmatprep.subr.mxu0 %v3470_v52 }
 0xe61   :  { %1186 = vmatpush2.msra.mxu0 %v3471_v53 }
 0xe62   :  { %1187 = vmatprep.subr.mxu0 %v3472_v3 }
 0xe63   :  { %1188 = vmatpush2.msra.mxu0 %v3473_v5 }
 0xe64   :  { %1189 = vmatprep.subr.mxu0 %v3474_v6 }
 0xe65   :  { %1190 = vmatpush2.msra.mxu0 %v3475_v7 }
 0xe66   :  { %1191 = vmatprep.subr.mxu0 %v3476_v8 }
 0xe67   :  { %1192 = vmatpush2.msra.mxu0 %v3477_v9  ;;  %v3495_v9 = vld [vmem:[#allocation37_spill] sm:$0xff] }
 0xe68   :  { %1193 = vmatprep.subr.mxu0 %v3478_v10  ;;  %v182_v10 = vadd.f32 %v3495_v9, %v3492_v40 }
 0xe69   :  { %1194 = vmatpush2.msra.mxu0 %v3479_v13 }
 0xe6a   :  { %1195 = vmatprep.subr.mxu0 %v3480_v14  ;;  %v3496_v14 = vld [vmem:[#allocation38_spill] sm:$0xff] }
 0xe6b   :  { %1196 = vmatpush2.msra.mxu0 %v3481_v15  ;;  %v184_v15 = vadd.f32 %v3496_v14, %v3364_v28 }
 0xe6c   :  { %1197 = vmatprep.subr.mxu0 %v3482_v16 }
 0xe6d   :  { %1198 = vmatpush2.msra.mxu0 %v3483_v17 }
 0xe6e   :  { %1199 = vmatprep.subr.mxu0 %v3484_v18 }
 0xe6f   :  { %1200 = vmatpush2.msra.mxu0 %v3485_v19 }
 0xe70   :  { %1201 = vmatprep.subr.mxu0 %v3486_v20 }
 0xe71   :  { %1202 = vmatpush2.msra.mxu0 %v3487_v30 }
 0xe72   :  { %1203 = vmatprep.subr.mxu0 %v3488_v24 }
 0xe73   :  { %1204 = vmatpush2.msra.mxu0 %v3489_v41 }
 0xe74   :  { %1205 = vmatprep.subr.mxu0 %v3490_v39 }
 0xe75   :  { %1206 = vmatpush2.msra.mxu0 %v3491_v27 }
 0xef6   :  { %v975_v32 = vpop.f32.mrf.mxu0 }
 0xef7   :  { %v976_v31 = vadd.f32 %v975_v32, %v176_v11 }
 0xef8   :  { %v977_v37 = vpop.f32.mrf.mxu0 }
 0xef9   :  { %v1393_v38 = vmul.f32 -1.442695, %v976_v31  ;;  %v978_v26 = vadd.f32 %v977_v37, %v178_v34 }
 0xefb   :  { %1501 = vpow2.f32 %v1393_v38  ;;  %v1394_v4 = vmul.f32 -1.442695, %v978_v26 }
 0xefd   :  { %1503 = vpow2.f32 %v1394_v4 }
 0xf08   :  { %v1502_v22 = vpop.eup %1501 }
 0xf09   :  { %v986_v12 = vadd.f32 1.0, %v1502_v22 }
 0xf0a   :  { %v1504_v42 = vpop.eup %1503 }
 0xf0b   :  { %1505 = vrcp.f32 %v986_v12  ;;  %v987_v45 = vadd.f32 1.0, %v1504_v42 }
 0xf0d   :  { %1507 = vrcp.f32 %v987_v45 }
 0xf18   :  { %v1506_v46 = vpop.eup %1505 }
 0xf19   :  { %v992_v29 = vmul.f32 2.0, %v1506_v46 }
 0xf1a   :  { %v1508_v54 = vpop.eup %1507 }
 0xf1b   :  { %v1395_v36 = vadd.f32 -1.0, %v992_v29  ;;  %v993_v60 = vmul.f32 2.0, %v1508_v54 }
 0xf1d   :  { %v996_v61 = vsel %vm1698_vm3, %v1395_v36, %v1506_v46  ;;  %v1396_v55 = vadd.f32 -1.0, %v993_v60 }
 0xf1e   :  { %1000 = vrot.lane.b32.xlu0 %v996_v61, %s1624_s2  ;;  %v998_v59 = vmul.f32 %v996_v61, %v3045_v47 }
 0xf1f   :  { %v997_v62 = vsel %vm1708_vm6, %v1396_v55, %v1508_v54 }
 0xf20   :  { %1002 = vrot.lane.b32.xlu1 %v997_v62, %s1624_s2  ;;  %v999_v1 = vmul.f32 %v997_v62, %v3047_v50 }
 0xf90   :  { %v1001_v63 = vpop.permute.xlu0 %1000 }
 0xf92   :  { %v1003_v44 = vpop.permute.xlu1 %1002 }
 0xf93   :  { %v1004_v49 = vsel %vm297_vm7, %v1001_v63, %v1003_v44  ;;  %v1005_v57 = vsel %vm297_vm7, %v1003_v44, %v1001_v63 }
 0xf94   :  { %v1006_v43 = vmul.f32 %v1005_v57, %v996_v61  ;;  %v1007_v56 = vmul.f32 %v1004_v49, %v997_v62 }
 0xf96   :  { %1008 = vrot.lane.b32.xlu0 %v1006_v43, %s1625_s8  ;;  %1010 = vrot.lane.b32.xlu1 %v1007_v56, %s1625_s8 }
0x1008   :  { %v1009_v0 = vpop.permute.xlu0 %1008  ;;  %v1011_v2 = vpop.permute.xlu1 %1010 }
0x1009   :  { %v1012_v58 = vsel %vm255_vm2, %v1009_v0, %v1011_v2  ;;  %v1013_v48 = vsel %vm255_vm2, %v1011_v2, %v1009_v0 }
0x100a   :  { %v1014_v51 = vadd.f32 %v1012_v58, %v998_v59  ;;  %v1015_v52 = vadd.f32 %v1013_v48, %v999_v1 }
0x100c   :  { %1509 = vtanh.f32 %v1014_v51 }
0x100d   :  { %1511 = vtanh.f32 %v1015_v52 }
0x1019   :  { %v1510_v53 = vpop.eup %1509 }
0x101a   :  { %v1512_v3 = vpop.eup %1511  ;;  %1018 = vrot.lane.b32.xlu0 %v1510_v53, %s1624_s2 }
0x101b   :  { %1020 = vrot.lane.b32.xlu1 %v1512_v3, %s1624_s2 }
0x108c   :  { %v1019_v50 = vpop.permute.xlu0 %1018 }
0x108d   :  { %v1021_v5 = vpop.permute.xlu1 %1020 }
0x108e   :  { %v1022_v47 = vsel %vm297_vm7, %v1019_v50, %v1021_v5  ;;  %v1023_v6 = vsel %vm297_vm7, %v1021_v5, %v1019_v50 }
0x108f   :  { %v1024_v7 = vmul.f32 %v1023_v6, %v996_v61  ;;  %v1025_v8 = vmul.f32 %v1022_v47, %v997_v62 }
0x1091   :  { %1090 = vmatprep.mubr.f32.mxu1 %v1025_v8 }
0x1092   :  { %1091 = vmatmul.mubr.f32.vlgmr.msra.gmra.mxu1 %v1024_v7 }
0x1152   :  { %v1092_v13 = vpop.f32.mrf.mxu1 }
0x1153   :  { %v1093_v16 = vadd.f32 %v1092_v13, %v182_v10 }
0x1154   :  { %v1094_v17 = vpop.f32.mrf.mxu1 }
0x1155   :  { %v1397_v18 = vmul.f32 -1.442695, %v1093_v16  ;;  %v1095_v19 = vadd.f32 %v1094_v17, %v184_v15 }
0x1157   :  { %1513 = vpow2.f32 %v1397_v18  ;;  %v1398_v20 = vmul.f32 -1.442695, %v1095_v19 }
0x1159   :  { %1515 = vpow2.f32 %v1398_v20 }
0x1164   :  { %v1514_v30 = vpop.eup %1513 }
0x1165   :  { %v1103_v24 = vadd.f32 1.0, %v1514_v30 }
0x1166   :  { %v1516_v41 = vpop.eup %1515 }
0x1167   :  { %1517 = vrcp.f32 %v1103_v24  ;;  %v1104_v39 = vadd.f32 1.0, %v1516_v41 }
0x1169   :  { %1519 = vrcp.f32 %v1104_v39  ;;  %v1261_v39 = vld [vmem:[%s3220_s4 + $0x18] sm:$0xff] }
0x116a   :  { %1413 = vmatpush3.msra.mxu1 %v1261_v39 }
0x1174   :  { %v1518_v27 = vpop.eup %1517 }
0x1175   :  { %v1109_v21 = vmul.f32 2.0, %v1518_v27 }
0x1176   :  { %v1520_v40 = vpop.eup %1519 }
0x1177   :  { %v1399_v11 = vadd.f32 -1.0, %v1109_v21  ;;  %v1110_v32 = vmul.f32 2.0, %v1520_v40  ;;  %v3497_v21 = vmov 0.0  }
0x1178   :  { %1420 = vmatprep.mubr.msk.f32.mxu1 %vm1626_vm8, %v3497_v21  ;;  %1414 = vmatprep.subr.mxu1 %v3497_v21 }
0x1179   :  { %v1113_v28 = vsel %vm1698_vm3, %v1399_v11, %v1518_v27  ;;  %v1400_v35 = vadd.f32 -1.0, %v1110_v32  ;;  %v1260_v27 = vld [vmem:[%s3220_s4 + $0x10] sm:$0xff]  ;;  %v1258_v11 = vld [vmem:[%s3220_s4] sm:$0xff] }
0x117a   :  { %1117 = vrot.lane.b32.xlu0 %v1113_v28, %s1624_s2  ;;  %v1115_v46 = vmul.f32 %v1113_v28, %v1014_v51  ;;  %1415 = vmatpush3.msra.mxu1 %v1260_v27 }
0x117b   :  { %v1114_v34 = vsel %vm1708_vm6, %v1400_v35, %v1520_v40  ;;  %v1259_v40 = vld [vmem:[%s3220_s4 + $0x8] sm:$0xff]  ;;  %1416 = vmatprep.subr.mxu1 %v3497_v21 }
0x117c   :  { %1119 = vrot.lane.b32.xlu1 %v1114_v34, %s1624_s2  ;;  %v1116_v42 = vmul.f32 %v1114_v34, %v1015_v52  ;;  %1417 = vmatpush3.msra.mxu1 %v1259_v40 }
0x117d   :  { %1418 = vmatprep.subr.mxu1 %v3497_v21 }
0x117e   :  { %1419 = vmatpush3.msra.mxu1 %v1258_v11 }
0x11ec   :  { %v1118_v31 = vpop.permute.xlu0 %1117 }
0x11ee   :  { %v1120_v37 = vpop.permute.xlu1 %1119 }
0x11ef   :  { %v1121_v38 = vsel %vm297_vm7, %v1118_v31, %v1120_v37  ;;  %v1122_v26 = vsel %vm297_vm7, %v1120_v37, %v1118_v31 }
0x11f0   :  { %v1123_v4 = vmul.f32 %v1122_v26, %v1113_v28  ;;  %v1124_v22 = vmul.f32 %v1121_v38, %v1114_v34  ;;  %v1405_v26 = vld [vmem:[%s3221_s5] ss:$0 sm:$0xff] }
0x11f2   :  { %1125 = vrot.lane.b32.xlu0 %v1123_v4, %s1625_s8  ;;  %1127 = vrot.lane.b32.xlu1 %v1124_v22, %s1625_s8 }
0x1264   :  { %v1126_v12 = vpop.permute.xlu0 %1125  ;;  %v1128_v45 = vpop.permute.xlu1 %1127 }
0x1265   :  { %v1129_v29 = vsel %vm255_vm2, %v1126_v12, %v1128_v45  ;;  %v1130_v54 = vsel %vm255_vm2, %v1128_v45, %v1126_v12 }
0x1266   :  { %v1131_v36 = vadd.f32 %v1129_v29, %v1115_v46  ;;  %v1132_v60 = vadd.f32 %v1130_v54, %v1116_v42 }
0x1268   :  { %1521 = vtanh.f32 %v1131_v36 }
0x1269   :  { %1523 = vtanh.f32 %v1132_v60 }
0x1275   :  { %v1522_v61 = vpop.eup %1521 }
0x1276   :  { %v1524_v55 = vpop.eup %1523  ;;  %1135 = vrot.lane.b32.xlu0 %v1522_v61, %s1624_s2 }
0x1277   :  { %1137 = vrot.lane.b32.xlu1 %v1524_v55, %s1624_s2 }
0x12e8   :  { %v1136_v62 = vpop.permute.xlu0 %1135 }
0x12e9   :  { %v1138_v63 = vpop.permute.xlu1 %1137 }
0x12ea   :  { %v1139_v44 = vsel %vm297_vm7, %v1136_v62, %v1138_v63  ;;  %v1140_v49 = vsel %vm297_vm7, %v1138_v63, %v1136_v62 }
0x12eb   :  { %v1141_v57 = vmul.f32 %v1140_v49, %v1113_v28  ;;  %v1142_v43 = vmul.f32 %v1139_v44, %v1114_v34 }
0x12ed   :  { %1207 = vmatprep.mubr.f32.mxu0 %v1142_v43 }
0x12ee   :  { %1208 = vmatmul.mubr.f32.vlgmr.msra.gmra.mxu0 %v1141_v57 }
0x13ae   :  { %v1209_v56 = vpop.f32.mrf.mxu0 }
0x13af   :  { %v1210_v0 = vadd.f32 %v1209_v56, %v182_v10 }
0x13b0   :  { %v1211_v1 = vpop.f32.mrf.mxu0 }
0x13b1   :  { %v1401_v2 = vmul.f32 -1.442695, %v1210_v0  ;;  %v1212_v59 = vadd.f32 %v1211_v1, %v184_v15 }
0x13b3   :  { %1525 = vpow2.f32 %v1401_v2  ;;  %v1402_v58 = vmul.f32 -1.442695, %v1212_v59 }
0x13b5   :  { %1527 = vpow2.f32 %v1402_v58 }
0x13c0   :  { %v1526_v48 = vpop.eup %1525 }
0x13c1   :  { %v1220_v51 = vadd.f32 1.0, %v1526_v48 }
0x13c2   :  { %v1528_v52 = vpop.eup %1527 }
0x13c3   :  { %1529 = vrcp.f32 %v1220_v51  ;;  %v1221_v53 = vadd.f32 1.0, %v1528_v52 }
0x13c5   :  { %1531 = vrcp.f32 %v1221_v53 }
0x13d0   :  { %v1530_v3 = vpop.eup %1529 }
0x13d1   :  { %v1226_v50 = vmul.f32 2.0, %v1530_v3 }
0x13d2   :  { %v1532_v5 = vpop.eup %1531 }
0x13d3   :  { %v1403_v47 = vadd.f32 -1.0, %v1226_v50  ;;  %v1227_v6 = vmul.f32 2.0, %v1532_v5 }
0x13d5   :  { %v1230_v7 = vsel %vm1698_vm3, %v1403_v47, %v1530_v3  ;;  %v1404_v8 = vadd.f32 -1.0, %v1227_v6 }
0x13d6   :  { %1234 = vrot.lane.b32.xlu0 %v1230_v7, %s1624_s2  ;;  %v1232_v25 = vmul.f32 %v1230_v7, %v1131_v36 }
0x13d7   :  { %v1231_v9 = vsel %vm1708_vm6, %v1404_v8, %v1532_v5 }
0x13d8   :  { %1236 = vrot.lane.b32.xlu1 %v1231_v9, %s1624_s2  ;;  %v1233_v33 = vmul.f32 %v1231_v9, %v1132_v60 }
0x1448   :  { %v1235_v10 = vpop.permute.xlu0 %1234 }
0x144a   :  { %v1237_v13 = vpop.permute.xlu1 %1236 }
0x144b   :  { %v1238_v14 = vsel %vm297_vm7, %v1235_v10, %v1237_v13  ;;  %v1239_v15 = vsel %vm297_vm7, %v1237_v13, %v1235_v10 }
0x144c   :  { %v1240_v16 = vmul.f32 %v1239_v15, %v1230_v7  ;;  %v1241_v17 = vmul.f32 %v1238_v14, %v1231_v9 }
0x144e   :  { %1242 = vrot.lane.b32.xlu0 %v1240_v16, %s1625_s8  ;;  %1244 = vrot.lane.b32.xlu1 %v1241_v17, %s1625_s8 }
0x14c0   :  { %v1243_v18 = vpop.permute.xlu0 %1242  ;;  %v1245_v19 = vpop.permute.xlu1 %1244 }
0x14c1   :  { %v1246_v20 = vsel %vm255_vm2, %v1243_v18, %v1245_v19  ;;  %v1247_v30 = vsel %vm255_vm2, %v1245_v19, %v1243_v18 }
0x14c2   :  { %v1248_v24 = vadd.f32 %v1246_v20, %v1232_v25  ;;  %v1249_v41 = vadd.f32 %v1247_v30, %v1233_v33 }
0x14c4   :  { %1533 = vtanh.f32 %v1248_v24 }
0x14c5   :  { %1535 = vtanh.f32 %v1249_v41 }
0x14d1   :  { %v1534_v32 = vpop.eup %1533 }
0x14d2   :  { %v1536_v28 = vpop.eup %1535  ;;  %1252 = vrot.lane.b32.xlu0 %v1534_v32, %s1624_s2 }
0x14d3   :  { %1254 = vrot.lane.b32.xlu1 %v1536_v28, %s1624_s2  ;;  %s1601_s2 = scalar_lea.vmem %s1354_s18, 128 }
0x14d4   :  { %p1602_p0 = scmp.ne.s32.totalorder %s1354_s18, %s1601_s2  ;;  %p1607_p2 = scmp.lt.s32.totalorder %s1601_s2, %s1601_s2 }
0x14d6   :  { %p1608_p3 = por %p1607_p2, %p1606_p1 }
0x14d8   :  { %p1609_p4 = pnand %p1608_p3, %p1602_p0 }
0x1544   :  { %v1253_v35 = vpop.permute.xlu0 %1252 }
0x1545   :  { %v1255_v34 = vpop.permute.xlu1 %1254 }
0x1546   :  { %v1256_v31 = vsel %vm297_vm7, %v1253_v35, %v1255_v34 }
0x1547   :  { %v1257_v37 = vmul.f32 %v1256_v31, %v1231_v9 }
0x1549   :  { %1270 = vrot.lane.b32.xlu0 %v1257_v37, %s1627_s15 }
0x15bb   :  { %v1271_v38 = vpop.permute.xlu0 %1270 }
0x15bc   :  { %1421 = vmatmul.mubr.msk.f32.vlgmr.msra.gmra.mxu1 %vm1272_vm9, %v1271_v38 }
0x167c   :  { %v1341_v4 = vpop.f32.mrf.mxu1 }
0x167d   :  { %v1342_v22 = vadd.f32 %v1405_v26, %v1341_v4 }
0x167e   :  { %v1422_v12 = vpop.f32.mrf.mxu1 }
0x167f   :  { %1346 = vst.msk [vmem:[#allocation2] sm:$0xff] %vm1345_vm10, %v1342_v22 }
0x1680   :  { %1612 = shalt.err (!%p1609_p4)
}
0x1681   :  { %1356 = dma.vmem_to_hbm [thread:$0]  %s1354_s18, 128, %s3222_s6, [#allocation3]  }
0x1682   :  { %1621 = dma.done.wait [#allocation3], 128  }
0x1683   :  { %1622 = vsyncadd [#allocation3], 4294967168 }
0x1684   :  { %1360 = vsyncpa [#allocation3], 1 }

</bundles_post_ra>
